<compile_context>
chip_gen: v7x
topology: tpu7x:2x2x1
jax: 0.10.0
libtpu: 0.0.40
codegen_flags: <defaults>
</compile_context>

<pallas_src>
import functools

import jax
import jax.numpy as jnp
from jax.experimental import pallas as pl
from jax.experimental.pallas import tpu as pltpu


def _round_up(x, m):
    return (x + m - 1) // m * m


def _vmem_budget_bytes():
    """Generation-aware usable-VMEM budget (75% of physical capacity)."""
    try:
        cap = int(pltpu.get_tpu_info().vmem_capacity_bytes)
    except Exception:  # no TPU info available -> assume the smallest (v7x, 64 MiB)
        cap = 64 * 1024 * 1024
    return max(cap * 3 // 4, 32 * 1024 * 1024)


def prepare_adjacency(adjacency):
    """One-time preprocessing: pad N to a multiple of 128 and cast to bf16.

    Hoisted out of the per-forward path — the f32->bf16 cast of the (N, N)
    adjacency costs about as much HBM traffic as a whole layer.
    """
    N = adjacency.shape[0]
    assert adjacency.shape == (N, N), "adjacency must be square"
    Np = _round_up(N, 128)
    return jnp.pad(adjacency.astype(jnp.float32),
                   ((0, Np - N), (0, Np - N))).astype(jnp.bfloat16)


# ---------------------------------------------------------------------------
# Fused fast path: whole A / x / acc resident in VMEM, all layers in one call.
# ---------------------------------------------------------------------------
def _fused_kernel(adj_ref, emb_ref, out_ref, *, layers):
    a = adj_ref[...]                          # (Np, Np) bf16, VMEM resident
    acc = emb_ref[...]                        # (Np, Dp) f32 running sum (layer 0)
    x = acc.astype(jnp.bfloat16)
    for _ in range(layers):                   # static, small trip count
        y = jnp.dot(a, x, preferred_element_type=jnp.float32)
        acc = acc + y
        x = y.astype(jnp.bfloat16)
    out_ref[...] = acc


def _hyperconv_fused(adj_bf16, emb_f32, layers, vmem_limit):
    Np, Dp = emb_f32.shape
    cost = pl.CostEstimate(
        flops=2 * layers * Np * Np * Dp,
        transcendentals=0,
        bytes_accessed=Np * Np * 2 + 2 * Np * Dp * 4,
    )
    return pl.pallas_call(
        functools.partial(_fused_kernel, layers=layers),
        out_shape=jax.ShapeDtypeStruct((Np, Dp), jnp.float32),
        in_specs=[
            pl.BlockSpec(memory_space=pltpu.MemorySpace.VMEM),   # adjacency
            pl.BlockSpec(memory_space=pltpu.MemorySpace.VMEM),   # embedding
        ],
        out_specs=pl.BlockSpec(memory_space=pltpu.MemorySpace.VMEM),
        compiler_params=pltpu.CompilerParams(vmem_limit_bytes=int(vmem_limit)),
        cost_estimate=cost,
    )(adj_bf16, emb_f32)


# ---------------------------------------------------------------------------
# Tiled fallback for large N: per-layer  y = A @ x,  acc += y.
# ---------------------------------------------------------------------------
def _layer_kernel(a_ref, x_ref, acc_in_ref, y_ref, acc_out_ref, y_scratch, *, tk):
    """a_ref (tm,tk) bf16 streamed; x_ref (Np,Dp) bf16 resident; acc f32."""
    k = pl.program_id(1)

    @pl.when(k == 0)
    def _():
        y_scratch[...] = jnp.zeros_like(y_scratch)

    start = pl.multiple_of(k * tk, tk)
    x_blk = x_ref[pl.ds(start, tk), :]
    y_scratch[...] += jnp.dot(a_ref[...], x_blk,
                              preferred_element_type=jnp.float32)

    @pl.when(k == pl.num_programs(1) - 1)
    def _():
        y_ref[...] = y_scratch[...].astype(y_ref.dtype)
        acc_out_ref[...] = acc_in_ref[...] + y_scratch[...]


def _pick_tiles(Np):
    """Largest power-of-two-ish tiles (multiples of 128) that divide Np.

    tm keeps >= 2 row tiles so the 'parallel' axis feeds both v7x TensorCores;
    tk is as wide as possible to cut accumulator RMW passes / per-step overhead.
    """
    tm_cands = [t for t in (512, 256, 128) if Np % t == 0]
    tm = next((t for t in tm_cands if Np // t >= 2), tm_cands[-1])
    tk_cands = [t for t in (1024, 512, 256, 128) if Np % t == 0]
    tk = tk_cands[0]
    return tm, tk


def _hyperconv_layer(adj_bf16, x_bf16, acc_f32, *, tm, tk, vmem_cap):
    Np = adj_bf16.shape[0]
    Dp = x_bf16.shape[1]
    assert Np % tm == 0 and Np % tk == 0
    grid = (Np // tm, Np // tk)

    needed = (2 * tm * tk * 2                 # adjacency tile (bf16, 2 buffers)
              + 2 * Np * Dp * 2               # resident x (bf16, conservative x2)
              + 2 * tm * Dp * 4               # acc_in block
              + 2 * (tm * Dp * 2 + tm * Dp * 4)   # y / acc_out blocks
              + tm * Dp * 4)                  # f32 scratch accumulator
    vmem_limit = int(min(max(needed * 3 // 2, 16 * 1024 * 1024), vmem_cap))

    cost = pl.CostEstimate(
        flops=2 * Np * Np * Dp,
        transcendentals=0,
        bytes_accessed=(Np * Np * 2          # adjacency (bf16)
                        + Np * Dp * 2        # x in (bf16)
                        + Np * Dp * 4 * 2    # acc in + out (f32)
                        + Np * Dp * 2),      # y out (bf16)
    )

    kernel = functools.partial(_layer_kernel, tk=tk)

    y, acc = pl.pallas_call(
        kernel,
        out_shape=(
            jax.ShapeDtypeStruct((Np, Dp), jnp.bfloat16),    # next-layer x
            jax.ShapeDtypeStruct((Np, Dp), jnp.float32),     # running sum
        ),
        grid_spec=pltpu.PrefetchScalarGridSpec(
            num_scalar_prefetch=0,
            grid=grid,
            in_specs=[
                pl.BlockSpec((tm, tk), lambda i, k: (i, k)),    # adjacency tile
                pl.BlockSpec((Np, Dp), lambda i, k: (0, 0)),    # resident x
                pl.BlockSpec((tm, Dp), lambda i, k: (i, 0)),    # acc in
            ],
            out_specs=(
                pl.BlockSpec((tm, Dp), lambda i, k: (i, 0)),    # y out
                pl.BlockSpec((tm, Dp), lambda i, k: (i, 0)),    # acc out
            ),
            scratch_shapes=[pltpu.VMEM((tm, Dp), jnp.float32)],
        ),
        input_output_aliases={2: 1},          # acc updated in place
        compiler_params=pltpu.CompilerParams(
            dimension_semantics=("parallel", "arbitrary"),
            vmem_limit_bytes=vmem_limit,
        ),
        cost_estimate=cost,
    )(adj_bf16, x_bf16, acc_f32)
    return y, acc


# ---------------------------------------------------------------------------
# Forward pass.
# ---------------------------------------------------------------------------
@functools.partial(jax.jit, static_argnames=("layers", "force_tiled"))
def hyperconv_fwd(adj_bf16, embedding, layers, force_tiled=False):
    """HyperConv.forward given a pre-padded bf16 adjacency (Np, Np)."""
    Np = adj_bf16.shape[0]
    N, D = embedding.shape
    assert Np % 128 == 0 and Np >= N, "adjacency must come from prepare_adjacency"
    Dp = _round_up(D, 128)

    emb_p = jnp.pad(embedding.astype(jnp.float32), ((0, Np - N), (0, Dp - D)))

    vmem_cap = _vmem_budget_bytes()
    # Rough VMEM need for the fused path: A + emb/out + live x/acc/y temps.
    fused_bytes = Np * Np * 2 + 6 * Np * Dp * 4

    if (not force_tiled) and fused_bytes <= vmem_cap:
        acc = _hyperconv_fused(adj_bf16, emb_p, layers, vmem_cap)
    else:
        tm, tk = _pick_tiles(Np)
        x = emb_p.astype(jnp.bfloat16)
        acc = emb_p
        for _ in range(layers):               # static trip count (self.layers)
            x, acc = _hyperconv_layer(adj_bf16, x, acc,
                                      tm=tm, tk=tk, vmem_cap=vmem_cap)

    return acc[:N, :D].astype(embedding.dtype)


def hyperconv(adjacency, embedding, layers):
    """Convenience wrapper matching HyperConv.forward(adjacency, embedding)."""
    return hyperconv_fwd(prepare_adjacency(adjacency), embedding, layers)


def hyperconv_ref(adjacency, embedding, layers):
    """Pure-JAX reference mirroring the kernel numerics (bf16 MXU, f32 acc)."""
    a = adjacency.astype(jnp.bfloat16)
    x = embedding.astype(jnp.bfloat16)
    acc = embedding.astype(jnp.float32)
    for _ in range(layers):
        y = jnp.dot(a, x, preferred_element_type=jnp.float32)
        acc = acc + y
        x = y.astype(jnp.bfloat16)
    return acc.astype(embedding.dtype)


if __name__ == "__main__":
    N, D = 384, 100          # n_items, emb_size (DHCN default emb_size=100)
    layers = 3

    key = jax.random.PRNGKey(0)
    k_adj, k_emb = jax.random.split(key)

    # Deterministic dense stand-in for the sparse DHCN adjacency:
    # non-negative, row-normalized.
    adj_raw = jax.random.uniform(k_adj, (N, N), dtype=jnp.float32)
    adj = adj_raw / jnp.sum(adj_raw, axis=1, keepdims=True)

    # Item embedding table (the nn.Embedding weight passed in as `embedding`).
    emb = jax.random.normal(k_emb, (N, D), dtype=jnp.float32) * 0.1

    # One-time preprocessing, hoisted out of the per-forward path.
    adj_bf16 = jax.block_until_ready(prepare_adjacency(adj))

    ref = hyperconv_ref(adj, emb, layers)

    # Fused fast path (A resident in VMEM, all layers in one pallas_call).
    out_fused = jax.block_until_ready(hyperconv_fwd(adj_bf16, emb, layers))
    assert out_fused.shape == (N, D)
    err_f = float(jnp.max(jnp.abs(out_fused - ref)))
    assert jnp.allclose(out_fused, ref, atol=1e-2, rtol=1e-2), \
        f"fused path mismatch vs reference: {err_f}"

    # Tiled streaming path (what large-N inputs would take).
    out_tiled = jax.block_until_ready(
        hyperconv_fwd(adj_bf16, emb, layers, force_tiled=True))
    assert out_tiled.shape == (N, D)
    err_t = float(jnp.max(jnp.abs(out_tiled - ref)))
    assert jnp.allclose(out_tiled, ref, atol=1e-2, rtol=1e-2), \
        f"tiled path mismatch vs reference: {err_t}"

    print("KERNEL_OK")
</pallas_src>

<mosaic_0001>
module attributes {stable_mosaic.version = 11 : i64} {
  func.func @_fused_kernel(%arg0: memref<384x384xbf16, #tpu.memory_space<vmem>>, %arg1: memref<384x128xf32, #tpu.memory_space<vmem>>, %arg2: memref<384x128xf32, #tpu.memory_space<vmem>>) attributes {dimension_semantics = [], scalar_prefetch = 0 : i64, scratch_operands = 0 : i64, tpu.core_type = #tpu.core_type<tc>} {
    %c0 = arith.constant 0 : index
    %c0_0 = arith.constant 0 : index
    %0 = vector.load %arg0[%c0, %c0_0] : memref<384x384xbf16, #tpu.memory_space<vmem>>, vector<384x384xbf16>
    %c0_1 = arith.constant 0 : index
    %c0_2 = arith.constant 0 : index
    %1 = vector.load %arg1[%c0_1, %c0_2] : memref<384x128xf32, #tpu.memory_space<vmem>>, vector<384x128xf32>
    %2 = arith.truncf %1 : vector<384x128xf32> to vector<384x128xbf16>
    %cst = arith.constant dense<0.000000e+00> : vector<384x128xf32>
    %3 = tpu.matmul %0, %2, %cst {dimension_numbers = #tpu.dot_dimension_numbers<[1], [0], [0], [1], [0, 0, 1, 1], [], []>} : vector<384x384xbf16>, vector<384x128xbf16>, vector<384x128xf32> -> vector<384x128xf32>
    %4 = arith.addf %1, %3 : vector<384x128xf32>
    %5 = arith.truncf %3 : vector<384x128xf32> to vector<384x128xbf16>
    %cst_3 = arith.constant dense<0.000000e+00> : vector<384x128xf32>
    %6 = tpu.matmul %0, %5, %cst_3 {dimension_numbers = #tpu.dot_dimension_numbers<[1], [0], [0], [1], [0, 0, 1, 1], [], []>} : vector<384x384xbf16>, vector<384x128xbf16>, vector<384x128xf32> -> vector<384x128xf32>
    %7 = arith.addf %4, %6 : vector<384x128xf32>
    %8 = arith.truncf %6 : vector<384x128xf32> to vector<384x128xbf16>
    %cst_4 = arith.constant dense<0.000000e+00> : vector<384x128xf32>
    %9 = tpu.matmul %0, %8, %cst_4 {dimension_numbers = #tpu.dot_dimension_numbers<[1], [0], [0], [1], [0, 0, 1, 1], [], []>} : vector<384x384xbf16>, vector<384x128xbf16>, vector<384x128xf32> -> vector<384x128xf32>
    %10 = arith.addf %7, %9 : vector<384x128xf32>
    %c0_5 = arith.constant 0 : index
    %c0_6 = arith.constant 0 : index
    %11 = vector.load %arg2[%c0_5, %c0_6] : memref<384x128xf32, #tpu.memory_space<vmem>>, vector<384x128xf32>
    tpu.vector_store %arg2[%c0_5, %c0_6], %10 {strides = array<i32>} : memref<384x128xf32, #tpu.memory_space<vmem>>, vector<384x128xf32>,
    return
  }
}

</mosaic_0001>

<bundles_post_ra>
// kernel: hyperconv_fwd.1
= control target key start
LH: loop header
LB: loop body
LE: loop exit
PB: predicated region body
PF: predicated region fallthrough
CT: control target
= control target key end

     0   :  { %v4693_v0 = vmov 0   ;;  %s4690_s1 = inlined_call_operand.vmem [shape: f32[384,128], index: 1, kind: input, shape index: {}]   ;;  %s4691_s0 = inlined_call_operand.vmem [shape: bf16[384,384], index: 0, kind: input, shape index: {}]   ;;  %s4692_s2 = inlined_call_operand.vmem [shape: f32[384,128], index: 2, kind: output, shape index: {}]  }
   0x1   :  { %564 = vmatprep.subr.bf16.mxu0 %v4693_v0  ;;  %v108_v1 = vld [vmem:[%s4690_s1] sm:$0xff]  ;;  %v109_v2 = vld [vmem:[%s4690_s1 + $0x8] sm:$0xff]  ;;  %v110_v3 = vld [vmem:[%s4690_s1 + $0x10] sm:$0xff] }
   0x2   :  { %v156_v4 = vpack.c.bf16 %v109_v2, %v108_v1  ;;  %v111_v5 = vld [vmem:[%s4690_s1 + $0x18] sm:$0xff]  ;;  %v112_v7 = vld [vmem:[%s4690_s1 + $0x20] sm:$0xff]  ;;  %v113_v8 = vld [vmem:[%s4690_s1 + $0x28] sm:$0xff] }
   0x3   :  { %v157_v6 = vpack.c.bf16 %v111_v5, %v110_v3  ;;  %v158_v9 = vpack.c.bf16 %v113_v8, %v112_v7  ;;  %v114_v10 = vld [vmem:[%s4690_s1 + $0x30] sm:$0xff]  ;;  %v115_v11 = vld [vmem:[%s4690_s1 + $0x38] sm:$0xff]  ;;  %v116_v13 = vld [vmem:[%s4690_s1 + $0x40] sm:$0xff] }
   0x4   :  { %565 = vmatpush1.bf16.msra.mxu0 %v156_v4  ;;  %v159_v12 = vpack.c.bf16 %v115_v11, %v114_v10  ;;  %v2799_v14 = vld [vmem:[%s4691_s0 + $0x4] ss:$12 sps:$4 sm:$0xff]   ;;  %v117_v15 = vld [vmem:[%s4690_s1 + $0x48] sm:$0xff]  ;;  %v119_v18 = vld [vmem:[%s4690_s1 + $0x58] sm:$0xff] }
   0x5   :  { %566 = vmatprep.subr.bf16.mxu0 %v4693_v0  ;;  %596 = vmatprep.mubr.bf16.mxu0 %v2799_v14  ;;  %v160_v16 = vpack.c.bf16 %v117_v15, %v116_v13  ;;  %v118_v17 = vld [vmem:[%s4690_s1 + $0x50] sm:$0xff]  ;;  %v140_v19 = vld [vmem:[%s4690_s1 + $0x100] sm:$0xff]  ;;  %v141_v20 = vld [vmem:[%s4690_s1 + $0x108] sm:$0xff] }
   0x6   :  { %v2819_v21 = vpack.c.bf16 %v141_v20, %v140_v19  ;;  %v142_v22 = vld [vmem:[%s4690_s1 + $0x110] sm:$0xff]  ;;  %v143_v23 = vld [vmem:[%s4690_s1 + $0x118] sm:$0xff]  ;;  %v161_v24 = vpack.c.bf16 %v119_v18, %v118_v17  ;;  %v144_v26 = vld [vmem:[%s4690_s1 + $0x120] sm:$0xff] }
   0x7   :  { %v2827_v25 = vpack.c.bf16 %v143_v23, %v142_v22  ;;  %v120_v27 = vld [vmem:[%s4690_s1 + $0x60] sm:$0xff]  ;;  %v121_v28 = vld [vmem:[%s4690_s1 + $0x68] sm:$0xff]  ;;  %v122_v32 = vld [vmem:[%s4690_s1 + $0x70] sm:$0xff] }
   0x8   :  { %567 = vmatpush1.bf16.msra.mxu0 %v157_v6  ;;  %2518 = vmatprep.subr.bf16.mxu1 %v2819_v21  ;;  %v145_v29 = vld [vmem:[%s4690_s1 + $0x128] sm:$0xff]  ;;  %v162_v31 = vpack.c.bf16 %v121_v28, %v120_v27  ;;  %v146_v33 = vld [vmem:[%s4690_s1 + $0x130] sm:$0xff]  ;;  %v147_v34 = vld [vmem:[%s4690_s1 + $0x138] sm:$0xff] }
   0x9   :  { %568 = vmatprep.subr.bf16.mxu0 %v4693_v0  ;;  %2526 = vmatpush3.bf16.msra.mxu1 %v2819_v21  ;;  %v2845_v30 = vpack.c.bf16 %v145_v29, %v144_v26  ;;  %v123_v35 = vld [vmem:[%s4690_s1 + $0x78] sm:$0xff]  ;;  %v124_v36 = vld [vmem:[%s4690_s1 + $0x80] sm:$0xff]  ;;  %v2865_v37 = vpack.c.bf16 %v147_v34, %v146_v33  ;;  %v149_v39 = vld [vmem:[%s4690_s1 + $0x148] sm:$0xff] }
   0xa   :  { %2519 = vmatprep.subr.bf16.mxu1 %v2827_v25  ;;  %v148_v38 = vld [vmem:[%s4690_s1 + $0x140] sm:$0xff]  ;;  %v163_v40 = vpack.c.bf16 %v123_v35, %v122_v32  ;;  %v2559_v41 = vld [vmem:[%s4691_s0 + $0xc8] ss:$12 sps:$4 sm:$0xff]   ;;  %v151_v47 = vld [vmem:[%s4690_s1 + $0x158] sm:$0xff] }
   0xb   :  { %v125_v42 = vld [vmem:[%s4690_s1 + $0x88] sm:$0xff]  ;;  %2358 = vmatprep.mubr.bf16.mxu1 %v2559_v41  ;;  %v126_v43 = vld [vmem:[%s4690_s1 + $0x90] sm:$0xff]  ;;  %v2885_v44 = vpack.c.bf16 %v149_v39, %v148_v38  ;;  %v127_v48 = vld [vmem:[%s4690_s1 + $0x98] sm:$0xff] }
   0xc   :  { %569 = vmatpush1.bf16.msra.mxu0 %v158_v9  ;;  %v150_v45 = vld [vmem:[%s4690_s1 + $0x150] sm:$0xff]  ;;  %v164_v46 = vpack.c.bf16 %v125_v42, %v124_v36  ;;  %v128_v49 = vld [vmem:[%s4690_s1 + $0xa0] sm:$0xff]  ;;  %v165_v51 = vpack.c.bf16 %v127_v48, %v126_v43  ;;  %v153_v53 = vld [vmem:[%s4690_s1 + $0x168] sm:$0xff] }
   0xd   :  { %570 = vmatprep.subr.bf16.mxu0 %v4693_v0  ;;  %2527 = vmatpush3.bf16.msra.mxu1 %v2827_v25  ;;  %v2902_v50 = vpack.c.bf16 %v151_v47, %v150_v45  ;;  %v152_v52 = vld [vmem:[%s4690_s1 + $0x160] sm:$0xff]  ;;  %v129_v54 = vld [vmem:[%s4690_s1 + $0xa8] sm:$0xff]  ;;  %v154_v56 = vld [vmem:[%s4690_s1 + $0x170] sm:$0xff] }
   0xe   :  { %2520 = vmatprep.subr.bf16.mxu1 %v2845_v30  ;;  %v2916_v55 = vpack.c.bf16 %v153_v53, %v152_v52  ;;  %v166_v57 = vpack.c.bf16 %v129_v54, %v128_v49  ;;  %v155_v58 = vld [vmem:[%s4690_s1 + $0x178] sm:$0xff]  ;;  %v130_v59 = vld [vmem:[%s4690_s1 + $0xb0] sm:$0xff]  ;;  %v132_v63 = vld [vmem:[%s4690_s1 + $0xc0] sm:$0xff] }
   0xf   :  { %v131_v60 = vld [vmem:[%s4690_s1 + $0xb8] sm:$0xff]  ;;  %v2933_v61 = vpack.c.bf16 %v155_v58, %v154_v56  ;;  %v133_v1 = vld [vmem:[%s4690_s1 + $0xc8] sm:$0xff]  ;;  %v134_v2 = vld [vmem:[%s4690_s1 + $0xd0] sm:$0xff] }
  0x10   :  { %571 = vmatpush1.bf16.msra.mxu0 %v159_v12  ;;  %v167_v62 = vpack.c.bf16 %v131_v60, %v130_v59  ;;  %v135_v3 = vld [vmem:[%s4690_s1 + $0xd8] sm:$0xff]  ;;  %v2953_v4 = vld [vmem:[%s4691_s0 + $0xe0] ss:$12 sps:$4 sm:$0xff]   ;;  %v168_v5 = vpack.c.bf16 %v133_v1, %v132_v63  ;;  %v138_v10 = vld [vmem:[%s4690_s1 + $0xf0] sm:$0xff] }
  0x11   :  { %572 = vmatprep.subr.bf16.mxu0 %v4693_v0  ;;  %2528 = vmatpush3.bf16.msra.mxu1 %v2845_v30  ;;  %4783 = vst [vmem:[#allocation2_spill] sm:$0xff] %v2953_v4  ;;  %v2958_v6 = vld [vmem:[%s4691_s0 + $0xf8] ss:$12 sps:$4 sm:$0xff]   ;;  %v169_v8 = vpack.c.bf16 %v135_v3, %v134_v2  ;;  %v137_v9 = vld [vmem:[%s4690_s1 + $0xe8] sm:$0xff]  ;;  %v2981_v12 = vld [vmem:[%s4691_s0 + $0x110] ss:$12 sps:$4 sm:$0xff]  }
  0x12   :  { %2521 = vmatprep.subr.bf16.mxu1 %v2865_v37  ;;  %4784 = vst [vmem:[#allocation3_spill] sm:$0xff] %v2958_v6  ;;  %v136_v7 = vld [vmem:[%s4690_s1 + $0xe0] sm:$0xff]  ;;  %v139_v11 = vld [vmem:[%s4690_s1 + $0xf8] sm:$0xff]  ;;  %4785 = vst [vmem:[#allocation4_spill] sm:$0xff] %v2981_v12 }
  0x13   :  { %v170_v13 = vpack.c.bf16 %v137_v9, %v136_v7  ;;  %v2986_v15 = vld [vmem:[%s4691_s0 + $0x128] ss:$12 sps:$4 sm:$0xff]   ;;  %v2995_v17 = vld [vmem:[%s4691_s0] ss:$12 sps:$4 sm:$0xff]   ;;  %v3011_v20 = vld [vmem:[%s4691_s0 + $0x158] ss:$12 sps:$4 sm:$0xff]  }
  0x14   :  { %573 = vmatpush1.bf16.msra.mxu0 %v160_v16  ;;  %4786 = vst [vmem:[#allocation5_spill] sm:$0xff] %v2986_v15  ;;  %v171_v16 = vpack.c.bf16 %v139_v11, %v138_v10  ;;  %4787 = vst [vmem:[#allocation6_spill] sm:$0xff] %v2995_v17  ;;  %v3000_v18 = vld [vmem:[%s4691_s0 + $0x1c] ss:$12 sps:$4 sm:$0xff]   ;;  %v3006_v19 = vld [vmem:[%s4691_s0 + $0x140] ss:$12 sps:$4 sm:$0xff]  }
  0x15   :  { %574 = vmatprep.subr.bf16.mxu0 %v4693_v0  ;;  %2529 = vmatpush3.bf16.msra.mxu1 %v2865_v37  ;;  %4788 = vst [vmem:[#allocation7_spill] sm:$0xff] %v3000_v18  ;;  %4789 = vst [vmem:[#allocation8_spill] sm:$0xff] %v3006_v19  ;;  %v3022_v22 = vld [vmem:[%s4691_s0 + $0x18] ss:$12 sps:$4 sm:$0xff]   ;;  %v3027_v23 = vld [vmem:[%s4691_s0 + $0x34] ss:$12 sps:$4 sm:$0xff]  }
  0x16   :  { %2522 = vmatprep.subr.bf16.mxu1 %v2885_v44  ;;  %4790 = vst [vmem:[#allocation9_spill] sm:$0xff] %v3011_v20  ;;  %4791 = vst [vmem:[#allocation10_spill] sm:$0xff] %v3022_v22  ;;  %v3055_v26 = vld [vmem:[%s4691_s0 + $0x4c] ss:$12 sps:$4 sm:$0xff]   ;;  %v3078_v29 = vld [vmem:[%s4691_s0 + $0x48] ss:$12 sps:$4 sm:$0xff]  }
  0x17   :  { %4792 = vst [vmem:[#allocation11_spill] sm:$0xff] %v3027_v23  ;;  %4796 = vst [vmem:[#allocation15_spill] sm:$0xff] %v3055_v26  ;;  %v3061_v27 = vld [vmem:[%s4691_s0 + $0x1a0] ss:$12 sps:$4 sm:$0xff]   ;;  %v3067_v28 = vld [vmem:[%s4691_s0 + $0x1b8] ss:$12 sps:$4 sm:$0xff]  }
  0x18   :  { %575 = vmatpush1.bf16.msra.mxu0 %v161_v24  ;;  %v3039_v24 = vld [vmem:[%s4691_s0 + $0x188] ss:$12 sps:$4 sm:$0xff]   ;;  %4797 = vst [vmem:[#allocation16_spill] sm:$0xff] %v3061_v27  ;;  %4798 = vst [vmem:[#allocation17_spill] sm:$0xff] %v3067_v28  ;;  %v3106_v33 = vld [vmem:[%s4691_s0 + $0x60] ss:$12 sps:$4 sm:$0xff]  }
  0x19   :  { %576 = vmatprep.subr.bf16.mxu0 %v4693_v0  ;;  %2530 = vmatpush3.bf16.msra.mxu1 %v2885_v44  ;;  %4794 = vst [vmem:[#allocation13_spill] sm:$0xff] %v3039_v24  ;;  %4799 = vst [vmem:[#allocation18_spill] sm:$0xff] %v3078_v29  ;;  %v3096_v32 = vld [vmem:[%s4691_s0 + $0x1e8] ss:$12 sps:$4 sm:$0xff]   ;;  %v3117_v35 = vld [vmem:[%s4691_s0 + $0x200] ss:$12 sps:$4 sm:$0xff]  }
  0x1a   :  { %2523 = vmatprep.subr.bf16.mxu1 %v2902_v50  ;;  %4802 = vst [vmem:[#allocation21_spill] sm:$0xff] %v3096_v32  ;;  %4803 = vst [vmem:[#allocation22_spill] sm:$0xff] %v3106_v33  ;;  %v3111_v34 = vld [vmem:[%s4691_s0 + $0x7c] ss:$12 sps:$4 sm:$0xff]   ;;  %v3125_v36 = vld [vmem:[%s4691_s0 + $0x78] ss:$12 sps:$4 sm:$0xff]  }
  0x1b   :  { %4804 = vst [vmem:[#allocation23_spill] sm:$0xff] %v3111_v34  ;;  %4805 = vst [vmem:[#allocation24_spill] sm:$0xff] %v3117_v35  ;;  %v3136_v38 = vld [vmem:[%s4691_s0 + $0x218] ss:$12 sps:$4 sm:$0xff]   ;;  %v3142_v39 = vld [vmem:[%s4691_s0 + $0x230] ss:$12 sps:$4 sm:$0xff]  }
  0x1c   :  { %577 = vmatpush1.bf16.msra.mxu0 %v162_v31  ;;  %v3089_v31 = vld [vmem:[%s4691_s0 + $0x1d0] ss:$12 sps:$4 sm:$0xff]   ;;  %4806 = vst [vmem:[#allocation25_spill] sm:$0xff] %v3125_v36  ;;  %4808 = vst [vmem:[#allocation27_spill] sm:$0xff] %v3136_v38  ;;  %v3155_v41 = vld [vmem:[%s4691_s0 + $0xac] ss:$12 sps:$4 sm:$0xff]  }
  0x1d   :  { %578 = vmatprep.subr.bf16.mxu0 %v4693_v0  ;;  %2531 = vmatpush3.bf16.msra.mxu1 %v2902_v50  ;;  %4801 = vst [vmem:[#allocation20_spill] sm:$0xff] %v3089_v31  ;;  %4809 = vst [vmem:[#allocation28_spill] sm:$0xff] %v3142_v39  ;;  %v3162_v42 = vld [vmem:[%s4691_s0 + $0xa8] ss:$12 sps:$4 sm:$0xff]   ;;  %v3167_v43 = vld [vmem:[%s4691_s0 + $0xc4] ss:$12 sps:$4 sm:$0xff]  }
  0x1e   :  { %2524 = vmatprep.subr.bf16.mxu1 %v2916_v55  ;;  %4811 = vst [vmem:[#allocation30_spill] sm:$0xff] %v3155_v41  ;;  %4812 = vst [vmem:[#allocation31_spill] sm:$0xff] %v3162_v42  ;;  %v3186_v45 = vld [vmem:[%s4691_s0 + $0xd8] ss:$12 sps:$4 sm:$0xff]   ;;  %v3198_v47 = vld [vmem:[%s4691_s0 + $0xf0] ss:$12 sps:$4 sm:$0xff]  }
  0x1f   :  { %4813 = vst [vmem:[#allocation32_spill] sm:$0xff] %v3167_v43  ;;  %4816 = vst [vmem:[#allocation35_spill] sm:$0xff] %v3186_v45  ;;  %v3203_v48 = vld [vmem:[%s4691_s0 + $0x10c] ss:$12 sps:$4 sm:$0xff]   ;;  %v3210_v49 = vld [vmem:[%s4691_s0 + $0x108] ss:$12 sps:$4 sm:$0xff]  }
  0x20   :  { %579 = vmatpush1.bf16.msra.mxu0 %v163_v40  ;;  %v3149_v40 = vld [vmem:[%s4691_s0 + $0x90] ss:$12 sps:$4 sm:$0xff]   ;;  %4818 = vst [vmem:[#allocation37_spill] sm:$0xff] %v3198_v47  ;;  %4819 = vst [vmem:[#allocation38_spill] sm:$0xff] %v3203_v48  ;;  %v3234_v53 = vld [vmem:[%s4691_s0 + $0x138] ss:$12 sps:$4 sm:$0xff]  }
  0x21   :  { %580 = vmatprep.subr.bf16.mxu0 %v4693_v0  ;;  %2532 = vmatpush3.bf16.msra.mxu1 %v2916_v55  ;;  %4810 = vst [vmem:[#allocation29_spill] sm:$0xff] %v3149_v40  ;;  %4820 = vst [vmem:[#allocation39_spill] sm:$0xff] %v3210_v49  ;;  %v3227_v52 = vld [vmem:[%s4691_s0 + $0x13c] ss:$12 sps:$4 sm:$0xff]   ;;  %v3239_v54 = vld [vmem:[%s4691_s0 + $0x154] ss:$12 sps:$4 sm:$0xff]  }
  0x22   :  { %2525 = vmatprep.subr.bf16.mxu1 %v2933_v61  ;;  %4823 = vst [vmem:[#allocation42_spill] sm:$0xff] %v3227_v52  ;;  %4824 = vst [vmem:[#allocation43_spill] sm:$0xff] %v3234_v53  ;;  %v3251_v56 = vld [vmem:[%s4691_s0 + $0x16c] ss:$12 sps:$4 sm:$0xff]   ;;  %v3263_v58 = vld [vmem:[%s4691_s0 + $0x184] ss:$12 sps:$4 sm:$0xff]  }
  0x23   :  { %4825 = vst [vmem:[#allocation44_spill] sm:$0xff] %v3239_v54  ;;  %4827 = vst [vmem:[#allocation46_spill] sm:$0xff] %v3251_v56  ;;  %v3270_v59 = vld [vmem:[%s4691_s0 + $0x180] ss:$12 sps:$4 sm:$0xff]   ;;  %v3275_v60 = vld [vmem:[%s4691_s0 + $0x19c] ss:$12 sps:$4 sm:$0xff]  }
  0x24   :  { %581 = vmatpush1.bf16.msra.mxu0 %v164_v46  ;;  %v3191_v46 = vld [vmem:[%s4691_s0 + $0xf4] ss:$12 sps:$4 sm:$0xff]   ;;  %4829 = vst [vmem:[#allocation48_spill] sm:$0xff] %v3263_v58  ;;  %4830 = vst [vmem:[#allocation49_spill] sm:$0xff] %v3270_v59  ;;  %v3294_v63 = vld [vmem:[%s4691_s0 + $0x1b0] ss:$12 sps:$4 sm:$0xff]  }
  0x25   :  { %582 = vmatprep.subr.bf16.mxu0 %v4693_v0  ;;  %2533 = vmatpush3.bf16.msra.mxu1 %v2933_v61  ;;  %4817 = vst [vmem:[#allocation36_spill] sm:$0xff] %v3191_v46  ;;  %4831 = vst [vmem:[#allocation50_spill] sm:$0xff] %v3275_v60  ;;  %v3299_v1 = vld [vmem:[%s4691_s0 + $0x1cc] ss:$12 sps:$4 sm:$0xff]   ;;  %v3306_v2 = vld [vmem:[%s4691_s0 + $0x1c8] ss:$12 sps:$4 sm:$0xff]  }
  0x26   :  { %1086 = vmatprep.subr.bf16.mxu1 %v4693_v0  ;;  %4834 = vst [vmem:[#allocation53_spill] sm:$0xff] %v3294_v63  ;;  %4835 = vst [vmem:[#allocation54_spill] sm:$0xff] %v3299_v1  ;;  %v3311_v3 = vld [vmem:[%s4691_s0 + $0x1e4] ss:$12 sps:$4 sm:$0xff]   ;;  %v3323_v7 = vld [vmem:[%s4691_s0 + $0x1fc] ss:$12 sps:$4 sm:$0xff]  }
  0x27   :  { %4836 = vst [vmem:[#allocation55_spill] sm:$0xff] %v3306_v2  ;;  %4837 = vst [vmem:[#allocation56_spill] sm:$0xff] %v3311_v3  ;;  %v3335_v9 = vld [vmem:[%s4691_s0 + $0x214] ss:$12 sps:$4 sm:$0xff]   ;;  %v3342_v10 = vld [vmem:[%s4691_s0 + $0x210] ss:$12 sps:$4 sm:$0xff]  }
  0x28   :  { %583 = vmatpush1.bf16.msra.mxu0 %v165_v51  ;;  %2359 = vmatmul.mubr.bf16.vlgmr.msra.gmra.mrb[0].mxu1 %v2953_v4  ;;  %v3222_v51 = vld [vmem:[%s4691_s0 + $0x120] ss:$12 sps:$4 sm:$0xff]   ;;  %4839 = vst [vmem:[#allocation58_spill] sm:$0xff] %v3323_v7  ;;  %4841 = vst [vmem:[#allocation60_spill] sm:$0xff] %v3335_v9 }
  0x29   :  { %584 = vmatprep.subr.bf16.mxu0 %v4693_v0  ;;  %2362 = vmatprep.mubr.bf16.mxu1 %v2958_v6  ;;  %4822 = vst [vmem:[#allocation41_spill] sm:$0xff] %v3222_v51  ;;  %4842 = vst [vmem:[#allocation61_spill] sm:$0xff] %v3342_v10  ;;  %v3347_v11 = vld [vmem:[%s4691_s0 + $0x22c] ss:$12 sps:$4 sm:$0xff]  }
  0x2a   :  { %4843 = vst [vmem:[#allocation62_spill] sm:$0xff] %v3347_v11 }
  0x2c   :  { %585 = vmatpush1.bf16.msra.mxu0 %v166_v57  ;;  %v3258_v57 = vld [vmem:[%s4691_s0 + $0x168] ss:$12 sps:$4 sm:$0xff]  }
  0x2d   :  { %586 = vmatprep.subr.bf16.mxu0 %v4693_v0  ;;  %4828 = vst [vmem:[#allocation47_spill] sm:$0xff] %v3258_v57 }
  0x30   :  { %587 = vmatpush1.bf16.msra.mxu0 %v167_v62  ;;  %2363 = vmatmul.mubr.bf16.gmra.mrb[4].mxu1 %v2981_v12  ;;  %v3287_v62 = vld [vmem:[%s4691_s0 + $0x1b4] ss:$12 sps:$4 sm:$0xff]  }
  0x31   :  { %588 = vmatprep.subr.bf16.mxu0 %v4693_v0  ;;  %2366 = vmatprep.mubr.bf16.mxu1 %v2986_v15  ;;  %4833 = vst [vmem:[#allocation52_spill] sm:$0xff] %v3287_v62 }
  0x34   :  { %589 = vmatpush1.bf16.msra.mxu0 %v168_v5  ;;  %v3318_v5 = vld [vmem:[%s4691_s0 + $0x1e0] ss:$12 sps:$4 sm:$0xff]  }
  0x35   :  { %590 = vmatprep.subr.bf16.mxu0 %v4693_v0  ;;  %4838 = vst [vmem:[#allocation57_spill] sm:$0xff] %v3318_v5 }
  0x38   :  { %591 = vmatpush1.bf16.msra.mxu0 %v169_v8  ;;  %2367 = vmatmul.mubr.bf16.gmra.mrb[8].mxu1 %v3006_v19  ;;  %v3330_v8 = vld [vmem:[%s4691_s0 + $0x1f8] ss:$12 sps:$4 sm:$0xff]  }
  0x39   :  { %592 = vmatprep.subr.bf16.mxu0 %v4693_v0  ;;  %2370 = vmatprep.mubr.bf16.mxu1 %v3011_v20  ;;  %4840 = vst [vmem:[#allocation59_spill] sm:$0xff] %v3330_v8 }
  0x3c   :  { %593 = vmatpush1.bf16.msra.mxu0 %v170_v13  ;;  %v3354_v13 = vld [vmem:[%s4691_s0 + $0x228] ss:$12 sps:$4 sm:$0xff]  }
  0x3d   :  { %594 = vmatprep.subr.bf16.mxu0 %v4693_v0  ;;  %4844 = vst [vmem:[#allocation63_spill] sm:$0xff] %v3354_v13  ;;  %v3366_v0 = vld [vmem:[%s4691_s0 + $0x20] ss:$12 sps:$4 sm:$0xff]  }
  0x40   :  { %595 = vmatpush1.bf16.msra.mxu0 %v171_v16  ;;  %v3359_v16 = vld [vmem:[%s4691_s0 + $0x8] ss:$12 sps:$4 sm:$0xff]  }
  0x41   :  { %2326 = vmatprep.subr.bf16.mxu0 %v2819_v21  ;;  %4845 = vst [vmem:[#allocation64_spill] sm:$0xff] %v3359_v16 }
  0x43   :  { %597 = vmatmul.mubr.bf16.vlgmr.msra.gmra.mrb[0].mxu0 %v2995_v17 }
  0x44   :  { %604 = vmatprep.mubr.bf16.mxu0 %v3000_v18  ;;  %2327 = vmatpush3.bf16.msra.mxu0 %v2819_v21  ;;  %v3033_v21 = vld [vmem:[%s4691_s0 + $0x170] ss:$12 sps:$4 sm:$0xff]  }
  0x45   :  { %2328 = vmatprep.subr.bf16.mxu0 %v2827_v25  ;;  %4793 = vst [vmem:[#allocation12_spill] sm:$0xff] %v3033_v21  ;;  %2371 = vmatmul.mubr.bf16.gmra.mrb[12].mxu1 %v3033_v21 }
  0x46   :  { %2374 = vmatprep.mubr.bf16.mxu1 %v3039_v24 }
  0x48   :  { %2329 = vmatpush3.bf16.msra.mxu0 %v2827_v25  ;;  %v3050_v25 = vld [vmem:[%s4691_s0 + $0x30] ss:$12 sps:$4 sm:$0xff]  }
  0x49   :  { %2330 = vmatprep.subr.bf16.mxu0 %v2845_v30  ;;  %4795 = vst [vmem:[#allocation14_spill] sm:$0xff] %v3050_v25 }
  0x4b   :  { %605 = vmatmul.mubr.bf16.gmra.mrb[4].mxu0 %v3022_v22 }
  0x4c   :  { %612 = vmatprep.mubr.bf16.mxu0 %v3027_v23  ;;  %2331 = vmatpush3.bf16.msra.mxu0 %v2845_v30  ;;  %v3083_v30 = vld [vmem:[%s4691_s0 + $0x64] ss:$12 sps:$4 sm:$0xff]  }
  0x4d   :  { %2332 = vmatprep.subr.bf16.mxu0 %v2865_v37  ;;  %2375 = vmatmul.mubr.bf16.gmra.mrb[16].mxu1 %v3061_v27  ;;  %4800 = vst [vmem:[#allocation19_spill] sm:$0xff] %v3083_v30 }
  0x4e   :  { %2378 = vmatprep.mubr.bf16.mxu1 %v3067_v28 }
  0x50   :  { %2333 = vmatpush3.bf16.msra.mxu0 %v2865_v37  ;;  %v3130_v37 = vld [vmem:[%s4691_s0 + $0x94] ss:$12 sps:$4 sm:$0xff]  }
  0x51   :  { %2334 = vmatprep.subr.bf16.mxu0 %v2885_v44  ;;  %4807 = vst [vmem:[#allocation26_spill] sm:$0xff] %v3130_v37 }
  0x53   :  { %613 = vmatmul.mubr.bf16.gmra.mrb[8].mxu0 %v3050_v25 }
  0x54   :  { %620 = vmatprep.mubr.bf16.mxu0 %v3055_v26  ;;  %2335 = vmatpush3.bf16.msra.mxu0 %v2885_v44  ;;  %v3179_v44 = vld [vmem:[%s4691_s0 + $0xdc] ss:$12 sps:$4 sm:$0xff]  }
  0x55   :  { %2336 = vmatprep.subr.bf16.mxu0 %v2902_v50  ;;  %2379 = vmatmul.mubr.bf16.gmra.mrb[20].mxu1 %v3089_v31  ;;  %4815 = vst [vmem:[#allocation34_spill] sm:$0xff] %v3179_v44 }
  0x56   :  { %2382 = vmatprep.mubr.bf16.mxu1 %v3096_v32 }
  0x58   :  { %2337 = vmatpush3.bf16.msra.mxu0 %v2902_v50  ;;  %v3215_v50 = vld [vmem:[%s4691_s0 + $0x124] ss:$12 sps:$4 sm:$0xff]  }
  0x59   :  { %2338 = vmatprep.subr.bf16.mxu0 %v2916_v55  ;;  %4821 = vst [vmem:[#allocation40_spill] sm:$0xff] %v3215_v50 }
  0x5b   :  { %621 = vmatmul.mubr.bf16.gmra.mrb[12].mxu0 %v3078_v29 }
  0x5c   :  { %628 = vmatprep.mubr.bf16.mxu0 %v3083_v30  ;;  %2339 = vmatpush3.bf16.msra.mxu0 %v2916_v55  ;;  %v3246_v55 = vld [vmem:[%s4691_s0 + $0x150] ss:$12 sps:$4 sm:$0xff]  }
  0x5d   :  { %2340 = vmatprep.subr.bf16.mxu0 %v2933_v61  ;;  %2383 = vmatmul.mubr.bf16.gmra.mrb[24].mxu1 %v3117_v35  ;;  %4826 = vst [vmem:[#allocation45_spill] sm:$0xff] %v3246_v55 }
  0x5e   :  { %2386 = vmatprep.mubr.bf16.mxu1 %v3136_v38 }
  0x60   :  { %2341 = vmatpush3.bf16.msra.mxu0 %v2933_v61  ;;  %v3282_v61 = vld [vmem:[%s4691_s0 + $0x198] ss:$12 sps:$4 sm:$0xff]  }
  0x61   :  { %4832 = vst [vmem:[#allocation51_spill] sm:$0xff] %v3282_v61 }
  0x63   :  { %629 = vmatmul.mubr.bf16.gmra.mrb[16].mxu0 %v3106_v33 }
  0x64   :  { %636 = vmatprep.mubr.bf16.mxu0 %v3111_v34 }
  0x65   :  { %2387 = vmatmul.mubr.bf16.gmra.mrb[28].mxu1 %v3142_v39 }
  0x66   :  { %1118 = vmatprep.mubr.bf16.mxu1 %v2799_v14  ;;  %v3174_v14 = vld [vmem:[%s4691_s0 + $0xc0] ss:$12 sps:$4 sm:$0xff]  }
  0x67   :  { %4814 = vst [vmem:[#allocation33_spill] sm:$0xff] %v3174_v14 }
  0x6b   :  { %637 = vmatmul.mubr.bf16.gmra.mrb[20].mxu0 %v3125_v36 }
  0x6c   :  { %644 = vmatprep.mubr.bf16.mxu0 %v3130_v37 }
  0x73   :  { %645 = vmatmul.mubr.bf16.gmra.mrb[24].mxu0 %v3149_v40 }
  0x74   :  { %652 = vmatprep.mubr.bf16.mxu0 %v3155_v41 }
  0x7b   :  { %653 = vmatmul.mubr.bf16.gmra.mrb[28].mxu0 %v3162_v42 }
  0x7c   :  { %660 = vmatprep.mubr.bf16.mxu0 %v3167_v43 }
  0x83   :  { %661 = vmatmul.mubr.bf16.gmra.mrb[32].mxu0 %v3174_v14 }
  0x84   :  { %668 = vmatprep.mubr.bf16.mxu0 %v3179_v44 }
  0x8b   :  { %669 = vmatmul.mubr.bf16.gmra.mrb[36].mxu0 %v3186_v45 }
  0x8c   :  { %676 = vmatprep.mubr.bf16.mxu0 %v3191_v46 }
  0x93   :  { %677 = vmatmul.mubr.bf16.gmra.mrb[40].mxu0 %v3198_v47 }
  0x94   :  { %684 = vmatprep.mubr.bf16.mxu0 %v3203_v48 }
  0x9b   :  { %685 = vmatmul.mubr.bf16.gmra.mrb[44].mxu0 %v3210_v49 }
  0x9c   :  { %692 = vmatprep.mubr.bf16.mxu0 %v3215_v50 }
  0xa3   :  { %693 = vmatmul.mubr.bf16.gmra.mrb[48].mxu0 %v3222_v51 }
  0xa4   :  { %700 = vmatprep.mubr.bf16.mxu0 %v3227_v52 }
  0xab   :  { %701 = vmatmul.mubr.bf16.gmra.mrb[52].mxu0 %v3234_v53 }
  0xac   :  { %708 = vmatprep.mubr.bf16.mxu0 %v3239_v54 }
  0xb3   :  { %709 = vmatmul.mubr.bf16.gmra.mrb[56].mxu0 %v3246_v55 }
  0xb4   :  { %716 = vmatprep.mubr.bf16.mxu0 %v3251_v56 }
  0xbb   :  { %717 = vmatmul.mubr.bf16.gmra.mrb[60].mxu0 %v3258_v57 }
  0xbc   :  { %724 = vmatprep.mubr.bf16.mxu0 %v3263_v58  ;;  %v3420_v58 = vld [vmem:[%s4691_s0 + $0xb0] ss:$12 sps:$4 sm:$0xff]  }
  0xbd   :  { %4846 = vst [vmem:[#allocation65_spill] sm:$0xff] %v3420_v58 }
  0xc3   :  { %725 = vmatmul.mubr.bf16.gmra.mrb[64].mxu0 %v3270_v59 }
  0xc4   :  { %732 = vmatprep.mubr.bf16.mxu0 %v3275_v60 }
  0xcb   :  { %733 = vmatmul.mubr.bf16.gmra.mrb[68].mxu0 %v3282_v61 }
  0xcc   :  { %740 = vmatprep.mubr.bf16.mxu0 %v3287_v62 }
  0xd3   :  { %741 = vmatmul.mubr.bf16.gmra.mrb[72].mxu0 %v3294_v63 }
  0xd4   :  { %748 = vmatprep.mubr.bf16.mxu0 %v3299_v1 }
  0xdb   :  { %749 = vmatmul.mubr.bf16.gmra.mrb[76].mxu0 %v3306_v2  ;;  %v3403_v2 = vld [vmem:[%s4691_s0 + $0x98] ss:$12 sps:$4 sm:$0xff]  }
  0xdc   :  { %756 = vmatprep.mubr.bf16.mxu0 %v3311_v3  ;;  %v3398_v3 = vld [vmem:[%s4691_s0 + $0x80] ss:$12 sps:$4 sm:$0xff]  }
  0xe3   :  { %757 = vmatmul.mubr.bf16.gmra.mrb[80].mxu0 %v3318_v5 }
  0xe4   :  { %764 = vmatprep.mubr.bf16.mxu0 %v3323_v7 }
  0xeb   :  { %765 = vmatmul.mubr.bf16.gmra.mrb[84].mxu0 %v3330_v8 }
  0xec   :  { %772 = vmatprep.mubr.bf16.mxu0 %v3335_v9 }
  0xf3   :  { %773 = vmatmul.mubr.bf16.gmra.mrb[88].mxu0 %v3342_v10  ;;  %v3383_v10 = vld [vmem:[%s4691_s0 + $0x68] ss:$12 sps:$4 sm:$0xff]  }
  0xf4   :  { %780 = vmatprep.mubr.bf16.mxu0 %v3347_v11  ;;  %v3371_v11 = vld [vmem:[%s4691_s0 + $0x38] ss:$12 sps:$4 sm:$0xff]  }
  0xfb   :  { %781 = vmatmul.mubr.bf16.gmra.mrb[92].mxu0 %v3354_v13  ;;  %v3378_v13 = vld [vmem:[%s4691_s0 + $0x50] ss:$12 sps:$4 sm:$0xff]   ;;  %v3385_v9 = vpop.f32.mrb[0].mxu1 }
  0xfc   :  { %2342 = vmatprep.mubr.bf16.mxu0 %v3359_v16  ;;  %v3387_v8 = vpop.f32.mrb[1].mxu1 }
  0xfd   :  { %v3389_v7 = vpop.f32.mrb[2].mxu1 }
  0xfe   :  { %v3392_v5 = vpop.f32.mrb[3].mxu1 }
 0x103   :  { %2343 = vmatmul.mubr.bf16.vlgmr.msra.gmra.mrb[96].mxu0 %v3366_v0  ;;  %v3405_v1 = vpop.f32.mrb[4].mxu1 }
 0x104   :  { %2346 = vmatprep.mubr.bf16.mxu0 %v3371_v11  ;;  %v3407_v63 = vpop.f32.mrb[5].mxu1 }
 0x105   :  { %v3409_v62 = vpop.f32.mrb[6].mxu1 }
 0x106   :  { %v3412_v61 = vpop.f32.mrb[7].mxu1 }
 0x10b   :  { %2347 = vmatmul.mubr.bf16.gmra.mrb[100].mxu0 %v3378_v13  ;;  %v3424_v56 = vpop.f32.mrb[8].mxu1 }
 0x10c   :  { %2350 = vmatprep.mubr.bf16.mxu0 %v3383_v10  ;;  %v3426_v54 = vpop.f32.mrb[9].mxu1 }
 0x10d   :  { %v3428_v53 = vpop.f32.mrb[10].mxu1 }
 0x10e   :  { %v3431_v52 = vpop.f32.mrb[11].mxu1 }
 0x113   :  { %2351 = vmatmul.mubr.bf16.gmra.mrb[104].mxu0 %v3398_v3 }
 0x114   :  { %2354 = vmatprep.mubr.bf16.mxu0 %v3403_v2 }
 0x116   :  { %v3415_v60 = vpop.f32.mrb[0].mxu0 }
 0x117   :  { %v600_v59 = vpop.f32.mrb[1].mxu0 }
 0x118   :  { %v3422_v57 = vpop.f32.mrb[2].mxu0  ;;  %v3438_v49 = vpop.f32.mrb[12].mxu1 }
 0x119   :  { %v603_v55 = vpop.f32.mrb[3].mxu0  ;;  %v3440_v47 = vpop.f32.mrb[13].mxu1 }
 0x11a   :  { %v3442_v55 = vpop.f32.mrb[14].mxu1 }
 0x11b   :  { %2355 = vmatmul.mubr.bf16.gmra.mrb[108].mxu0 %v3420_v58  ;;  %v3444_v46 = vpop.f32.mrb[15].mxu1 }
 0x11c   :  { %2406 = vmatprep.mubr.bf16.mxu0 %v3359_v16 }
 0x11e   :  { %v3434_v59 = vpop.f32.mrb[4].mxu0 }
 0x11f   :  { %v608_v51 = vpop.f32.mrb[5].mxu0 }
 0x120   :  { %v3436_v50 = vpop.f32.mrb[6].mxu0  ;;  %v3450_v43 = vpop.f32.mrb[16].mxu1 }
 0x121   :  { %v611_v48 = vpop.f32.mrb[7].mxu0  ;;  %v3452_v51 = vpop.f32.mrb[17].mxu1 }
 0x122   :  { %v3454_v41 = vpop.f32.mrb[18].mxu1 }
 0x123   :  { %v3456_v40 = vpop.f32.mrb[19].mxu1 }
 0x126   :  { %v3446_v45 = vpop.f32.mrb[8].mxu0 }
 0x127   :  { %v616_v44 = vpop.f32.mrb[9].mxu0 }
 0x128   :  { %v3448_v14 = vpop.f32.mrb[10].mxu0  ;;  %v3462_v34 = vpop.f32.mrb[20].mxu1 }
 0x129   :  { %v619_v42 = vpop.f32.mrb[11].mxu0  ;;  %v3464_v44 = vpop.f32.mrb[21].mxu1 }
 0x12a   :  { %v3466_v30 = vpop.f32.mrb[22].mxu1 }
 0x12b   :  { %v3468_v29 = vpop.f32.mrb[23].mxu1 }
 0x12e   :  { %v3458_v48 = vpop.f32.mrb[12].mxu0 }
 0x12f   :  { %v624_v37 = vpop.f32.mrb[13].mxu0 }
 0x130   :  { %v3460_v36 = vpop.f32.mrb[14].mxu0  ;;  %v3474_v26 = vpop.f32.mrb[24].mxu1 }
 0x131   :  { %v627_v33 = vpop.f32.mrb[15].mxu0  ;;  %v3476_v37 = vpop.f32.mrb[25].mxu1 }
 0x132   :  { %v3478_v38 = vpop.f32.mrb[26].mxu1 }
 0x133   :  { %v3480_v35 = vpop.f32.mrb[27].mxu1 }
 0x136   :  { %v3470_v42 = vpop.f32.mrb[16].mxu0 }
 0x137   :  { %v632_v16 = vpop.f32.mrb[17].mxu0 }
 0x138   :  { %v3472_v39 = vpop.f32.mrb[18].mxu0  ;;  %v3486_v31 = vpop.f32.mrb[28].mxu1 }
 0x139   :  { %v635_v25 = vpop.f32.mrb[19].mxu0  ;;  %v3490_v18 = vpop.f32.mrb[29].mxu1 }
 0x13a   :  { %v3492_v25 = vpop.f32.mrb[30].mxu1 }
 0x13b   :  { %v3496_v27 = vpop.f32.mrb[31].mxu1 }
 0x13e   :  { %v3482_v33 = vpop.f32.mrb[20].mxu0 }
 0x13f   :  { %v640_v23 = vpop.f32.mrb[21].mxu0 }
 0x140   :  { %v3484_v22 = vpop.f32.mrb[22].mxu0 }
 0x141   :  { %v643_v32 = vpop.f32.mrb[23].mxu0 }
 0x146   :  { %v3488_v16 = vpop.f32.mrb[24].mxu0 }
 0x147   :  { %v648_v17 = vpop.f32.mrb[25].mxu0 }
 0x148   :  { %v3494_v28 = vpop.f32.mrb[26].mxu0 }
 0x149   :  { %4847 = vst [vmem:[#allocation66_spill] sm:$0xff] %v3494_v28  ;;  %v651_v24 = vpop.f32.mrb[27].mxu0 }
 0x14e   :  { %v3498_v21 = vpop.f32.mrb[28].mxu0 }
 0x14f   :  { %v656_v23 = vpop.f32.mrb[29].mxu0 }
 0x150   :  { %v3500_v20 = vpop.f32.mrb[30].mxu0 }
 0x151   :  { %4848 = vst [vmem:[#allocation67_spill] sm:$0xff] %v3500_v20  ;;  %v659_v32 = vpop.f32.mrb[31].mxu0 }
 0x156   :  { %v662_v19 = vpop.f32.mrb[32].mxu0 }
 0x157   :  { %v3503_v15 = vadd.f32 %v3387_v8, %v662_v19  ;;  %v664_v12 = vpop.f32.mrb[33].mxu0 }
 0x158   :  { %v665_v6 = vpop.f32.mrb[34].mxu0 }
 0x159   :  { %v3506_v17 = vadd.f32 %v3392_v5, %v665_v6  ;;  %v667_v4 = vpop.f32.mrb[35].mxu0 }
 0x15e   :  { %v670_v24 = vpop.f32.mrb[36].mxu0 }
 0x15f   :  { %v3511_v58 = vadd.f32 %v3385_v9, %v670_v24  ;;  %v672_v23 = vpop.f32.mrb[37].mxu0 }
 0x160   :  { %v673_v20 = vpop.f32.mrb[38].mxu0 }
 0x161   :  { %v3514_v32 = vadd.f32 %v3389_v7, %v673_v20  ;;  %v675_v19 = vpop.f32.mrb[39].mxu0 }
 0x166   :  { %v678_v8 = vpop.f32.mrb[40].mxu0 }
 0x167   :  { %v3519_v6 = vadd.f32 %v3407_v63, %v678_v8  ;;  %v680_v4 = vpop.f32.mrb[41].mxu0 }
 0x168   :  { %v681_v5 = vpop.f32.mrb[42].mxu0 }
 0x169   :  { %v3522_v28 = vadd.f32 %v3412_v61, %v681_v5  ;;  %v683_v9 = vpop.f32.mrb[43].mxu0 }
 0x16e   :  { %v686_v23 = vpop.f32.mrb[44].mxu0 }
 0x16f   :  { %v3527_v20 = vadd.f32 %v3405_v1, %v686_v23  ;;  %v688_v7 = vpop.f32.mrb[45].mxu0 }
 0x170   :  { %v689_v19 = vpop.f32.mrb[46].mxu0 }
 0x171   :  { %v3530_v12 = vadd.f32 %v3409_v62, %v689_v19  ;;  %v691_v63 = vpop.f32.mrb[47].mxu0 }
 0x176   :  { %v694_v4 = vpop.f32.mrb[48].mxu0 }
 0x177   :  { %v3535_v61 = vadd.f32 %v3426_v54, %v694_v4  ;;  %v696_v5 = vpop.f32.mrb[49].mxu0 }
 0x178   :  { %v697_v9 = vpop.f32.mrb[50].mxu0 }
 0x179   :  { %v3538_v24 = vadd.f32 %v3431_v52, %v697_v9  ;;  %v699_v1 = vpop.f32.mrb[51].mxu0 }
 0x17b   :  { %4849 = vst [vmem:[#allocation68_spill] sm:$0xff] %v3538_v24 }
 0x17e   :  { %v702_v7 = vpop.f32.mrb[52].mxu0 }
 0x17f   :  { %v3543_v62 = vadd.f32 %v3424_v56, %v702_v7  ;;  %v704_v19 = vpop.f32.mrb[53].mxu0 }
 0x180   :  { %v705_v63 = vpop.f32.mrb[54].mxu0 }
 0x181   :  { %4850 = vst [vmem:[#allocation69_spill] sm:$0xff] %v3543_v62  ;;  %v3546_v8 = vadd.f32 %v3428_v53, %v705_v63  ;;  %v707_v54 = vpop.f32.mrb[55].mxu0 }
 0x183   :  { %4851 = vst [vmem:[#allocation70_spill] sm:$0xff] %v3546_v8 }
 0x186   :  { %v710_v5 = vpop.f32.mrb[56].mxu0 }
 0x187   :  { %v3551_v52 = vadd.f32 %v3440_v47, %v710_v5  ;;  %v712_v9 = vpop.f32.mrb[57].mxu0 }
 0x188   :  { %v713_v1 = vpop.f32.mrb[58].mxu0 }
 0x189   :  { %4852 = vst [vmem:[#allocation71_spill] sm:$0xff] %v3551_v52  ;;  %v3554_v23 = vadd.f32 %v3444_v46, %v713_v1  ;;  %v715_v56 = vpop.f32.mrb[59].mxu0 }
 0x18b   :  { %4853 = vst [vmem:[#allocation72_spill] sm:$0xff] %v3554_v23 }
 0x18e   :  { %v718_v19 = vpop.f32.mrb[60].mxu0 }
 0x18f   :  { %v3559_v53 = vadd.f32 %v3438_v49, %v718_v19  ;;  %v720_v63 = vpop.f32.mrb[61].mxu0 }
 0x190   :  { %v721_v54 = vpop.f32.mrb[62].mxu0 }
 0x191   :  { %4854 = vst [vmem:[#allocation73_spill] sm:$0xff] %v3559_v53  ;;  %v3562_v4 = vadd.f32 %v3442_v55, %v721_v54  ;;  %v723_v47 = vpop.f32.mrb[63].mxu0 }
 0x193   :  { %4855 = vst [vmem:[#allocation74_spill] sm:$0xff] %v3562_v4  ;;  %v1077_v5 = vpack.c.bf16 %v3562_v4, %v3559_v53 }
 0x196   :  { %v726_v9 = vpop.f32.mrb[64].mxu0 }
 0x197   :  { %v3567_v46 = vadd.f32 %v3452_v51, %v726_v9  ;;  %v728_v1 = vpop.f32.mrb[65].mxu0 }
 0x198   :  { %v729_v56 = vpop.f32.mrb[66].mxu0 }
 0x199   :  { %4856 = vst [vmem:[#allocation75_spill] sm:$0xff] %v3567_v46  ;;  %v3570_v7 = vadd.f32 %v3456_v40, %v729_v56  ;;  %v731_v49 = vpop.f32.mrb[67].mxu0 }
 0x19b   :  { %4857 = vst [vmem:[#allocation76_spill] sm:$0xff] %v3570_v7  ;;  %v1078_v19 = vpack.c.bf16 %v3570_v7, %v3567_v46 }
 0x19d   :  { %2390 = vmatprep.subr.bf16.mxu0 %v1078_v19 }
 0x19e   :  { %v734_v55 = vpop.f32.mrb[68].mxu0  ;;  %2391 = vmatpush3.bf16.msra.mxu0 %v1078_v19 }
 0x19f   :  { %v3575_v63 = vadd.f32 %v3450_v43, %v734_v55  ;;  %v736_v54 = vpop.f32.mrb[69].mxu0 }
 0x1a0   :  { %v737_v47 = vpop.f32.mrb[70].mxu0 }
 0x1a1   :  { %4858 = vst [vmem:[#allocation77_spill] sm:$0xff] %v3575_v63  ;;  %v3578_v51 = vadd.f32 %v3454_v41, %v737_v47  ;;  %v739_v9 = vpop.f32.mrb[71].mxu0 }
 0x1a3   :  { %4859 = vst [vmem:[#allocation78_spill] sm:$0xff] %v3578_v51  ;;  %v1079_v40 = vpack.c.bf16 %v3578_v51, %v3575_v63 }
 0x1a5   :  { %2392 = vmatprep.subr.bf16.mxu0 %v1079_v40 }
 0x1a6   :  { %v742_v1 = vpop.f32.mrb[72].mxu0  ;;  %2393 = vmatpush3.bf16.msra.mxu0 %v1079_v40 }
 0x1a7   :  { %v3583_v56 = vadd.f32 %v3464_v44, %v742_v1  ;;  %v744_v49 = vpop.f32.mrb[73].mxu0 }
 0x1a8   :  { %v745_v19 = vpop.f32.mrb[74].mxu0 }
 0x1a9   :  { %4860 = vst [vmem:[#allocation79_spill] sm:$0xff] %v3583_v56  ;;  %v3586_v43 = vadd.f32 %v3468_v29, %v745_v19  ;;  %v747_v55 = vpop.f32.mrb[75].mxu0 }
 0x1ab   :  { %4861 = vst [vmem:[#allocation80_spill] sm:$0xff] %v3586_v43  ;;  %v1080_v41 = vpack.c.bf16 %v3586_v43, %v3583_v56 }
 0x1ad   :  { %2394 = vmatprep.subr.bf16.mxu0 %v1080_v41 }
 0x1ae   :  { %v750_v54 = vpop.f32.mrb[76].mxu0  ;;  %2395 = vmatpush3.bf16.msra.mxu0 %v1080_v41 }
 0x1af   :  { %v3591_v47 = vadd.f32 %v3462_v34, %v750_v54  ;;  %v752_v9 = vpop.f32.mrb[77].mxu0 }
 0x1b0   :  { %v753_v40 = vpop.f32.mrb[78].mxu0 }
 0x1b1   :  { %4862 = vst [vmem:[#allocation81_spill] sm:$0xff] %v3591_v47  ;;  %v3594_v44 = vadd.f32 %v3466_v30, %v753_v40  ;;  %v755_v1 = vpop.f32.mrb[79].mxu0 }
 0x1b3   :  { %4863 = vst [vmem:[#allocation82_spill] sm:$0xff] %v3594_v44  ;;  %v1081_v29 = vpack.c.bf16 %v3594_v44, %v3591_v47  ;;  %v4946_v47 = vld [vmem:[#allocation63_spill] sm:$0xff] }
 0x1b5   :  { %2396 = vmatprep.subr.bf16.mxu0 %v1081_v29 }
 0x1b6   :  { %v758_v49 = vpop.f32.mrb[80].mxu0  ;;  %2397 = vmatpush3.bf16.msra.mxu0 %v1081_v29 }
 0x1b7   :  { %v3599_v19 = vadd.f32 %v3476_v37, %v758_v49  ;;  %v760_v55 = vpop.f32.mrb[81].mxu0 }
 0x1b8   :  { %v761_v41 = vpop.f32.mrb[82].mxu0 }
 0x1b9   :  { %4864 = vst [vmem:[#allocation83_spill] sm:$0xff] %v3599_v19  ;;  %v3602_v34 = vadd.f32 %v3480_v35, %v761_v41  ;;  %v763_v54 = vpop.f32.mrb[83].mxu0 }
 0x1bb   :  { %4865 = vst [vmem:[#allocation84_spill] sm:$0xff] %v3602_v34  ;;  %v1082_v30 = vpack.c.bf16 %v3602_v34, %v3599_v19  ;;  %v4945_v34 = vld [vmem:[#allocation62_spill] sm:$0xff] }
 0x1bd   :  { %2398 = vmatprep.subr.bf16.mxu0 %v1082_v30 }
 0x1be   :  { %v766_v9 = vpop.f32.mrb[84].mxu0  ;;  %2399 = vmatpush3.bf16.msra.mxu0 %v1082_v30 }
 0x1bf   :  { %v3607_v40 = vadd.f32 %v3474_v26, %v766_v9  ;;  %v768_v1 = vpop.f32.mrb[85].mxu0 }
 0x1c0   :  { %v769_v29 = vpop.f32.mrb[86].mxu0 }
 0x1c1   :  { %4866 = vst [vmem:[#allocation85_spill] sm:$0xff] %v3607_v40  ;;  %v3610_v37 = vadd.f32 %v3478_v38, %v769_v29  ;;  %v771_v49 = vpop.f32.mrb[87].mxu0 }
 0x1c3   :  { %4867 = vst [vmem:[#allocation86_spill] sm:$0xff] %v3610_v37  ;;  %v1083_v35 = vpack.c.bf16 %v3610_v37, %v3607_v40  ;;  %v4944_v40 = vld [vmem:[#allocation61_spill] sm:$0xff] }
 0x1c5   :  { %2400 = vmatprep.subr.bf16.mxu0 %v1083_v35 }
 0x1c6   :  { %v774_v55 = vpop.f32.mrb[88].mxu0  ;;  %2401 = vmatpush3.bf16.msra.mxu0 %v1083_v35 }
 0x1c7   :  { %v3615_v41 = vadd.f32 %v3490_v18, %v774_v55  ;;  %v776_v54 = vpop.f32.mrb[89].mxu0 }
 0x1c8   :  { %v777_v30 = vpop.f32.mrb[90].mxu0 }
 0x1c9   :  { %4868 = vst [vmem:[#allocation87_spill] sm:$0xff] %v3615_v41  ;;  %v3618_v26 = vadd.f32 %v3496_v27, %v777_v30  ;;  %v779_v9 = vpop.f32.mrb[91].mxu0 }
 0x1cb   :  { %4869 = vst [vmem:[#allocation88_spill] sm:$0xff] %v3618_v26  ;;  %v1084_v38 = vpack.c.bf16 %v3618_v26, %v3615_v41  ;;  %v4943_v26 = vld [vmem:[#allocation60_spill] sm:$0xff] }
 0x1cd   :  { %2402 = vmatprep.subr.bf16.mxu0 %v1084_v38 }
 0x1ce   :  { %v782_v1 = vpop.f32.mrb[92].mxu0  ;;  %2403 = vmatpush3.bf16.msra.mxu0 %v1084_v38 }
 0x1cf   :  { %v3623_v29 = vadd.f32 %v3486_v31, %v782_v1  ;;  %v784_v49 = vpop.f32.mrb[93].mxu0 }
 0x1d0   :  { %v785_v35 = vpop.f32.mrb[94].mxu0 }
 0x1d1   :  { %4870 = vst [vmem:[#allocation89_spill] sm:$0xff] %v3623_v29  ;;  %v3626_v18 = vadd.f32 %v3492_v25, %v785_v35  ;;  %v787_v55 = vpop.f32.mrb[95].mxu0 }
 0x1d3   :  { %4871 = vst [vmem:[#allocation90_spill] sm:$0xff] %v3626_v18  ;;  %v1085_v27 = vpack.c.bf16 %v3626_v18, %v3623_v29  ;;  %v4942_v29 = vld [vmem:[#allocation59_spill] sm:$0xff] }
 0x1d5   :  { %2404 = vmatprep.subr.bf16.mxu0 %v1085_v27 }
 0x1d6   :  { %v2344_v54 = vpop.f32.mrb[96].mxu0  ;;  %2405 = vmatpush3.bf16.msra.mxu0 %v1085_v27  ;;  %v4872_v27 = vmov 0  }
 0x1d7   :  { %v3631_v30 = vadd.f32 %v2344_v54, %v3434_v59  ;;  %v823_v9 = vpop.f32.mrb[97].mxu0 }
 0x1d8   :  { %v3634_v38 = vadd.f32 %v823_v9, %v3415_v60  ;;  %v2345_v31 = vpop.f32.mrb[98].mxu0 }
 0x1d9   :  { %v3637_v1 = vadd.f32 %v2345_v31, %v3436_v50  ;;  %v826_v25 = vpop.f32.mrb[99].mxu0  ;;  %2407 = vmatmul.mubr.bf16.vlgmr.msra.gmra.mrb[112].mxu0 %v3366_v0 }
 0x1da   :  { %v3641_v49 = vadd.f32 %v826_v25, %v3422_v57  ;;  %2410 = vmatprep.mubr.bf16.mxu0 %v3371_v11 }
 0x1db   :  { %v1063_v59 = vpack.c.bf16 %v3637_v1, %v3631_v30 }
 0x1dc   :  { %v1062_v35 = vpack.c.bf16 %v3641_v49, %v3634_v38 }
 0x1de   :  { %v2348_v60 = vpop.f32.mrb[100].mxu0  ;;  %1087 = vmatpush1.bf16.msra.mxu1 %v1062_v35 }
 0x1df   :  { %v3649_v55 = vadd.f32 %v2348_v60, %v3458_v48  ;;  %v839_v50 = vpop.f32.mrb[101].mxu0  ;;  %1088 = vmatprep.subr.bf16.mxu1 %v4872_v27 }
 0x1e0   :  { %v3653_v0 = vadd.f32 %v839_v50, %v3446_v45  ;;  %v2349_v57 = vpop.f32.mrb[102].mxu0  ;;  %v4873_v50 = vld [vmem:[#allocation67_spill] sm:$0xff] }
 0x1e1   :  { %v3656_v11 = vadd.f32 %v2349_v57, %v3460_v36  ;;  %v842_v54 = vpop.f32.mrb[103].mxu0  ;;  %2411 = vmatmul.mubr.bf16.gmra.mrb[116].mxu0 %v3378_v13 }
 0x1e2   :  { %v3660_v9 = vadd.f32 %v842_v54, %v3448_v14  ;;  %1089 = vmatpush1.bf16.msra.mxu1 %v1063_v59  ;;  %2414 = vmatprep.mubr.bf16.mxu0 %v3383_v10 }
 0x1e3   :  { %v1065_v48 = vpack.c.bf16 %v3656_v11, %v3649_v55  ;;  %1090 = vmatprep.subr.bf16.mxu1 %v4872_v27 }
 0x1e4   :  { %v1064_v45 = vpack.c.bf16 %v3660_v9, %v3653_v0 }
 0x1e6   :  { %v2352_v31 = vpop.f32.mrb[104].mxu0  ;;  %1091 = vmatpush1.bf16.msra.mxu1 %v1064_v45  ;;  %v4875_v45 = vld [vmem:[#allocation66_spill] sm:$0xff] }
 0x1e7   :  { %v3669_v36 = vadd.f32 %v2352_v31, %v3482_v33  ;;  %v855_v13 = vpop.f32.mrb[105].mxu0  ;;  %1092 = vmatprep.subr.bf16.mxu1 %v4872_v27 }
 0x1e8   :  { %v3673_v14 = vadd.f32 %v855_v13, %v3470_v42  ;;  %v2353_v10 = vpop.f32.mrb[106].mxu0 }
 0x1e9   :  { %v3676_v25 = vadd.f32 %v2353_v10, %v3484_v22  ;;  %v858_v59 = vpop.f32.mrb[107].mxu0  ;;  %2415 = vmatmul.mubr.bf16.gmra.mrb[120].mxu0 %v3398_v3  ;;  %v4877_v10 = vld [vmem:[#allocation2_spill] sm:$0xff] }
 0x1ea   :  { %v3680_v35 = vadd.f32 %v858_v59, %v3472_v39  ;;  %1093 = vmatpush1.bf16.msra.mxu1 %v1065_v48  ;;  %2418 = vmatprep.mubr.bf16.mxu0 %v3403_v2  ;;  %v4874_v48 = vld [vmem:[#allocation65_spill] sm:$0xff]  ;;  %v4878_v59 = vld [vmem:[#allocation3_spill] sm:$0xff] }
 0x1eb   :  { %v1067_v33 = vpack.c.bf16 %v3676_v25, %v3669_v36  ;;  %1094 = vmatprep.subr.bf16.mxu1 %v4872_v27 }
 0x1ec   :  { %v1066_v42 = vpack.c.bf16 %v3680_v35, %v3673_v14 }
 0x1ee   :  { %v2356_v60 = vpop.f32.mrb[108].mxu0  ;;  %1095 = vmatpush1.bf16.msra.mxu1 %v1066_v42  ;;  %v4880_v42 = vld [vmem:[#allocation4_spill] sm:$0xff] }
 0x1ef   :  { %v3689_v22 = vadd.f32 %v2356_v60, %v3498_v21  ;;  %v871_v3 = vpop.f32.mrb[109].mxu0  ;;  %1096 = vmatprep.subr.bf16.mxu1 %v4872_v27  ;;  %v3705_v21 = vld [vmem:[%s4691_s0 + $0xc8] ss:$12 sps:$4 sm:$0xff]   ;;  %v4881_v60 = vpack.c.bf16 %v3514_v32, %v3511_v58 }
 0x1f0   :  { %v3693_v39 = vadd.f32 %v871_v3, %v3488_v16  ;;  %v2357_v2 = vpop.f32.mrb[110].mxu0  ;;  %4876 = vst [vmem:[#allocation67_spill] sm:$0xff] %v3705_v21  ;;  %v4882_v3 = vld [vmem:[#allocation5_spill] sm:$0xff] }
 0x1f1   :  { %v3696_v57 = vadd.f32 %v2357_v2, %v4873_v50  ;;  %v874_v54 = vpop.f32.mrb[111].mxu0  ;;  %2419 = vmatmul.mubr.bf16.gmra.mrb[124].mxu0 %v4874_v48  ;;  %v4883_v2 = vpack.c.bf16 %v3522_v28, %v3519_v6  ;;  %v4884_v50 = vld [vmem:[#allocation8_spill] sm:$0xff]  ;;  %v4886_v48 = vld [vmem:[#allocation9_spill] sm:$0xff] }
 0x1f2   :  { %v3700_v31 = vadd.f32 %v874_v54, %v4875_v45  ;;  %1097 = vmatpush1.bf16.msra.mxu1 %v1067_v33  ;;  %2422 = vmatprep.mubr.bf16.mxu0 %v3705_v21  ;;  %v4879_v33 = vpack.c.bf16 %v3506_v17, %v3503_v15  ;;  %v4885_v54 = vpack.c.bf16 %v3530_v12, %v3527_v20 }
 0x1f3   :  { %v1069_v16 = vpack.c.bf16 %v3696_v57, %v3689_v22  ;;  %1098 = vmatprep.subr.bf16.mxu1 %v4872_v27  ;;  %v4887_v45 = vpack.c.bf16 %v3538_v24, %v3535_v61 }
 0x1f4   :  { %v1068_v13 = vpack.c.bf16 %v3700_v31, %v3693_v39 }
 0x1f6   :  { %1099 = vmatpush1.bf16.msra.mxu1 %v1068_v13  ;;  %v4889_v13 = vpack.c.bf16 %v3546_v8, %v3543_v62  ;;  %v2633_v8 = vld [vmem:[%s4690_s1] sm:$0xff] }
 0x1f7   :  { %1100 = vmatprep.subr.bf16.mxu1 %v4872_v27 }
 0x1f9   :  { %2423 = vmatmul.mubr.bf16.gmra.mrb[128].mxu0 %v4877_v10  ;;  %v4890_v10 = vld [vmem:[#allocation13_spill] sm:$0xff] }
 0x1fa   :  { %1101 = vmatpush1.bf16.msra.mxu1 %v1069_v16  ;;  %2426 = vmatprep.mubr.bf16.mxu0 %v4878_v59  ;;  %v4888_v16 = vld [vmem:[#allocation12_spill] sm:$0xff]  ;;  %v4891_v59 = vpack.c.bf16 %v3554_v23, %v3551_v52 }
 0x1fb   :  { %1102 = vmatprep.subr.bf16.mxu1 %v4872_v27 }
 0x1fe   :  { %1103 = vmatpush1.bf16.msra.mxu1 %v4879_v33  ;;  %v4892_v33 = vld [vmem:[#allocation16_spill] sm:$0xff] }
 0x1ff   :  { %1104 = vmatprep.subr.bf16.mxu1 %v4872_v27 }
 0x201   :  { %2427 = vmatmul.mubr.bf16.gmra.mrb[132].mxu0 %v4880_v42  ;;  %v4893_v42 = vld [vmem:[#allocation17_spill] sm:$0xff] }
 0x202   :  { %1105 = vmatpush1.bf16.msra.mxu1 %v4881_v60  ;;  %2430 = vmatprep.mubr.bf16.mxu0 %v4882_v3  ;;  %v4894_v60 = vld [vmem:[#allocation6_spill] sm:$0xff]  ;;  %v4895_v3 = vld [vmem:[#allocation7_spill] sm:$0xff] }
 0x203   :  { %1106 = vmatprep.subr.bf16.mxu1 %v4872_v27 }
 0x206   :  { %1107 = vmatpush1.bf16.msra.mxu1 %v4883_v2  ;;  %v4896_v2 = vld [vmem:[#allocation20_spill] sm:$0xff] }
 0x207   :  { %1108 = vmatprep.subr.bf16.mxu1 %v4872_v27 }
 0x209   :  { %2431 = vmatmul.mubr.bf16.gmra.mrb[136].mxu0 %v4884_v50  ;;  %v4897_v50 = vld [vmem:[#allocation21_spill] sm:$0xff] }
 0x20a   :  { %1109 = vmatpush1.bf16.msra.mxu1 %v4885_v54  ;;  %2434 = vmatprep.mubr.bf16.mxu0 %v4886_v48  ;;  %v4898_v54 = vld [vmem:[#allocation10_spill] sm:$0xff]  ;;  %v4899_v48 = vld [vmem:[#allocation11_spill] sm:$0xff] }
 0x20b   :  { %1110 = vmatprep.subr.bf16.mxu1 %v4872_v27 }
 0x20e   :  { %1111 = vmatpush1.bf16.msra.mxu1 %v4887_v45  ;;  %v4900_v45 = vld [vmem:[#allocation24_spill] sm:$0xff] }
 0x20f   :  { %1112 = vmatprep.subr.bf16.mxu1 %v4872_v27 }
 0x211   :  { %2435 = vmatmul.mubr.bf16.gmra.mrb[140].mxu0 %v4888_v16  ;;  %v4901_v16 = vld [vmem:[#allocation27_spill] sm:$0xff] }
 0x212   :  { %1113 = vmatpush1.bf16.msra.mxu1 %v4889_v13  ;;  %2438 = vmatprep.mubr.bf16.mxu0 %v4890_v10  ;;  %v4903_v13 = vld [vmem:[#allocation15_spill] sm:$0xff]  ;;  %v4904_v10 = vld [vmem:[#allocation28_spill] sm:$0xff] }
 0x213   :  { %1114 = vmatprep.subr.bf16.mxu1 %v4872_v27 }
 0x216   :  { %1115 = vmatpush1.bf16.msra.mxu1 %v4891_v59  ;;  %v4905_v59 = vld [vmem:[#allocation64_spill] sm:$0xff] }
 0x217   :  { %1116 = vmatprep.subr.bf16.mxu1 %v4872_v27 }
 0x219   :  { %2439 = vmatmul.mubr.bf16.gmra.mrb[144].mxu0 %v4892_v33  ;;  %v4906_v33 = vld [vmem:[#allocation18_spill] sm:$0xff] }
 0x21a   :  { %1117 = vmatpush1.bf16.msra.mxu1 %v1077_v5  ;;  %2442 = vmatprep.mubr.bf16.mxu0 %v4893_v42  ;;  %v4902_v5 = vld [vmem:[#allocation14_spill] sm:$0xff]  ;;  %v4907_v42 = vld [vmem:[#allocation19_spill] sm:$0xff] }
 0x21b   :  { %1608 = vmatprep.subr.bf16.mxu1 %v4872_v27 }
 0x21d   :  { %1119 = vmatmul.mubr.bf16.vlgmr.msra.gmra.mrb[32].mxu1 %v4894_v60  ;;  %v4908_v60 = vld [vmem:[#allocation22_spill] sm:$0xff] }
 0x21e   :  { %1126 = vmatprep.mubr.bf16.mxu1 %v4895_v3  ;;  %v4909_v3 = vld [vmem:[#allocation23_spill] sm:$0xff] }
 0x221   :  { %2443 = vmatmul.mubr.bf16.gmra.mrb[148].mxu0 %v4896_v2  ;;  %v4910_v2 = vld [vmem:[#allocation25_spill] sm:$0xff] }
 0x222   :  { %2446 = vmatprep.mubr.bf16.mxu0 %v4897_v50  ;;  %v4911_v50 = vld [vmem:[#allocation26_spill] sm:$0xff] }
 0x225   :  { %1127 = vmatmul.mubr.bf16.gmra.mrb[36].mxu1 %v4898_v54  ;;  %v4912_v54 = vld [vmem:[#allocation29_spill] sm:$0xff] }
 0x226   :  { %1134 = vmatprep.mubr.bf16.mxu1 %v4899_v48  ;;  %v4913_v48 = vld [vmem:[#allocation30_spill] sm:$0xff] }
 0x229   :  { %2447 = vmatmul.mubr.bf16.gmra.mrb[152].mxu0 %v4900_v45  ;;  %v4914_v45 = vld [vmem:[#allocation31_spill] sm:$0xff] }
 0x22a   :  { %2450 = vmatprep.mubr.bf16.mxu0 %v4901_v16  ;;  %v4915_v16 = vld [vmem:[#allocation32_spill] sm:$0xff] }
 0x22d   :  { %1135 = vmatmul.mubr.bf16.gmra.mrb[40].mxu1 %v4902_v5  ;;  %v4916_v5 = vld [vmem:[#allocation33_spill] sm:$0xff] }
 0x22e   :  { %1142 = vmatprep.mubr.bf16.mxu1 %v4903_v13  ;;  %v4917_v13 = vld [vmem:[#allocation34_spill] sm:$0xff] }
 0x231   :  { %2451 = vmatmul.mubr.bf16.gmra.mrb[156].mxu0 %v4904_v10  ;;  %v4918_v10 = vld [vmem:[#allocation35_spill] sm:$0xff] }
 0x232   :  { %2470 = vmatprep.mubr.bf16.mxu0 %v4905_v59  ;;  %v4919_v59 = vld [vmem:[#allocation36_spill] sm:$0xff] }
 0x235   :  { %1143 = vmatmul.mubr.bf16.gmra.mrb[44].mxu1 %v4906_v33  ;;  %v4920_v33 = vld [vmem:[#allocation37_spill] sm:$0xff] }
 0x236   :  { %1150 = vmatprep.mubr.bf16.mxu1 %v4907_v42  ;;  %v4921_v42 = vld [vmem:[#allocation38_spill] sm:$0xff] }
 0x23d   :  { %1151 = vmatmul.mubr.bf16.gmra.mrb[48].mxu1 %v4908_v60  ;;  %v4922_v60 = vld [vmem:[#allocation39_spill] sm:$0xff] }
 0x23e   :  { %1158 = vmatprep.mubr.bf16.mxu1 %v4909_v3  ;;  %v4923_v3 = vld [vmem:[#allocation40_spill] sm:$0xff] }
 0x245   :  { %1159 = vmatmul.mubr.bf16.gmra.mrb[52].mxu1 %v4910_v2  ;;  %v4924_v2 = vld [vmem:[#allocation41_spill] sm:$0xff] }
 0x246   :  { %1166 = vmatprep.mubr.bf16.mxu1 %v4911_v50  ;;  %v4925_v50 = vld [vmem:[#allocation42_spill] sm:$0xff] }
 0x24d   :  { %1167 = vmatmul.mubr.bf16.gmra.mrb[56].mxu1 %v4912_v54  ;;  %v4926_v54 = vld [vmem:[#allocation43_spill] sm:$0xff] }
 0x24e   :  { %1174 = vmatprep.mubr.bf16.mxu1 %v4913_v48  ;;  %v4927_v48 = vld [vmem:[#allocation44_spill] sm:$0xff] }
 0x255   :  { %1175 = vmatmul.mubr.bf16.gmra.mrb[60].mxu1 %v4914_v45  ;;  %v4928_v45 = vld [vmem:[#allocation45_spill] sm:$0xff] }
 0x256   :  { %1182 = vmatprep.mubr.bf16.mxu1 %v4915_v16  ;;  %v4929_v16 = vld [vmem:[#allocation46_spill] sm:$0xff] }
 0x25d   :  { %1183 = vmatmul.mubr.bf16.gmra.mrb[64].mxu1 %v4916_v5  ;;  %v4930_v5 = vld [vmem:[#allocation47_spill] sm:$0xff] }
 0x25e   :  { %1190 = vmatprep.mubr.bf16.mxu1 %v4917_v13  ;;  %v4931_v13 = vld [vmem:[#allocation48_spill] sm:$0xff] }
 0x265   :  { %1191 = vmatmul.mubr.bf16.gmra.mrb[68].mxu1 %v4918_v10  ;;  %v4932_v10 = vld [vmem:[#allocation49_spill] sm:$0xff] }
 0x266   :  { %1198 = vmatprep.mubr.bf16.mxu1 %v4919_v59  ;;  %v4933_v59 = vld [vmem:[#allocation50_spill] sm:$0xff] }
 0x26d   :  { %1199 = vmatmul.mubr.bf16.gmra.mrb[72].mxu1 %v4920_v33  ;;  %v4934_v33 = vld [vmem:[#allocation51_spill] sm:$0xff] }
 0x26e   :  { %1206 = vmatprep.mubr.bf16.mxu1 %v4921_v42  ;;  %v4935_v42 = vld [vmem:[#allocation52_spill] sm:$0xff] }
 0x275   :  { %1207 = vmatmul.mubr.bf16.gmra.mrb[76].mxu1 %v4922_v60 }
 0x276   :  { %1214 = vmatprep.mubr.bf16.mxu1 %v4923_v3  ;;  %v4936_v3 = vld [vmem:[#allocation53_spill] sm:$0xff] }
 0x27d   :  { %1215 = vmatmul.mubr.bf16.gmra.mrb[80].mxu1 %v4924_v2 }
 0x27e   :  { %1222 = vmatprep.mubr.bf16.mxu1 %v4925_v50  ;;  %v4937_v50 = vld [vmem:[#allocation54_spill] sm:$0xff] }
 0x285   :  { %1223 = vmatmul.mubr.bf16.gmra.mrb[84].mxu1 %v4926_v54 }
 0x286   :  { %1230 = vmatprep.mubr.bf16.mxu1 %v4927_v48 }
 0x28d   :  { %1231 = vmatmul.mubr.bf16.gmra.mrb[88].mxu1 %v4928_v45 }
 0x28e   :  { %1238 = vmatprep.mubr.bf16.mxu1 %v4929_v16  ;;  %v4938_v16 = vld [vmem:[#allocation55_spill] sm:$0xff] }
 0x295   :  { %1239 = vmatmul.mubr.bf16.gmra.mrb[92].mxu1 %v4930_v5 }
 0x296   :  { %1246 = vmatprep.mubr.bf16.mxu1 %v4931_v13  ;;  %v4939_v13 = vld [vmem:[#allocation56_spill] sm:$0xff] }
 0x29d   :  { %1247 = vmatmul.mubr.bf16.gmra.mrb[96].mxu1 %v4932_v10 }
 0x29e   :  { %1254 = vmatprep.mubr.bf16.mxu1 %v4933_v59 }
 0x2a5   :  { %1255 = vmatmul.mubr.bf16.gmra.mrb[100].mxu1 %v4934_v33 }
 0x2a6   :  { %1262 = vmatprep.mubr.bf16.mxu1 %v4935_v42  ;;  %v4940_v42 = vld [vmem:[#allocation57_spill] sm:$0xff] }
 0x2ac   :  { %v3799_v60 = vpop.f32.mrb[112].mxu0 }
 0x2ad   :  { %1263 = vmatmul.mubr.bf16.gmra.mrb[104].mxu1 %v4936_v3  ;;  %v1345_v2 = vpop.f32.mrb[113].mxu0 }
 0x2ae   :  { %1270 = vmatprep.mubr.bf16.mxu1 %v4937_v50  ;;  %v3803_v54 = vpop.f32.mrb[114].mxu0  ;;  %v4941_v50 = vld [vmem:[#allocation58_spill] sm:$0xff] }
 0x2af   :  { %v1348_v48 = vpop.f32.mrb[115].mxu0 }
 0x2b4   :  { %v3805_v45 = vpop.f32.mrb[116].mxu0 }
 0x2b5   :  { %1271 = vmatmul.mubr.bf16.gmra.mrb[108].mxu1 %v4938_v16  ;;  %v3808_v5 = vpop.f32.mrb[117].mxu0 }
 0x2b6   :  { %1278 = vmatprep.mubr.bf16.mxu1 %v4939_v13  ;;  %v3811_v10 = vpop.f32.mrb[118].mxu0 }
 0x2b7   :  { %v3813_v59 = vpop.f32.mrb[119].mxu0 }
 0x2bc   :  { %v3815_v33 = vpop.f32.mrb[120].mxu0 }
 0x2bd   :  { %1279 = vmatmul.mubr.bf16.gmra.mrb[112].mxu1 %v4940_v42  ;;  %v3818_v3 = vpop.f32.mrb[121].mxu0 }
 0x2be   :  { %1286 = vmatprep.mubr.bf16.mxu1 %v4941_v50  ;;  %v3821_v21 = vpop.f32.mrb[122].mxu0 }
 0x2bf   :  { %v3823_v18 = vpop.f32.mrb[123].mxu0 }
 0x2c4   :  { %v3825_v16 = vpop.f32.mrb[124].mxu0 }
 0x2c5   :  { %1287 = vmatmul.mubr.bf16.gmra.mrb[116].mxu1 %v4942_v29  ;;  %v3828_v13 = vpop.f32.mrb[125].mxu0 }
 0x2c6   :  { %1294 = vmatprep.mubr.bf16.mxu1 %v4943_v26  ;;  %v3831_v41 = vpop.f32.mrb[126].mxu0 }
 0x2c7   :  { %v3833_v37 = vpop.f32.mrb[127].mxu0 }
 0x2cc   :  { %v3835_v42 = vpop.f32.mrb[128].mxu0 }
 0x2cd   :  { %1295 = vmatmul.mubr.bf16.gmra.mrb[120].mxu1 %v4944_v40  ;;  %v3838_v50 = vpop.f32.mrb[129].mxu0  ;;  %v2632_v40 = vld [vmem:[%s4691_s0 + $0x4] ss:$12 sps:$4 sm:$0xff]  }
 0x2ce   :  { %1302 = vmatprep.mubr.bf16.mxu1 %v4945_v34  ;;  %v3841_v19 = vpop.f32.mrb[130].mxu0 }
 0x2cf   :  { %v3843_v44 = vpop.f32.mrb[131].mxu0 }
 0x2d4   :  { %v3845_v29 = vpop.f32.mrb[132].mxu0 }
 0x2d5   :  { %1303 = vmatmul.mubr.bf16.gmra.mrb[124].mxu1 %v4946_v47  ;;  %v3848_v26 = vpop.f32.mrb[133].mxu0 }
 0x2d6   :  { %v3850_v43 = vpop.f32.mrb[134].mxu0  ;;  %1640 = vmatprep.mubr.bf16.mxu1 %v2632_v40 }
 0x2d7   :  { %v3855_v56 = vpop.f32.mrb[135].mxu0 }
 0x2dc   :  { %v3857_v34 = vpop.f32.mrb[136].mxu0 }
 0x2dd   :  { %4947 = vst [vmem:[#allocation65_spill] sm:$0xff] %v3857_v34  ;;  %v3859_v51 = vpop.f32.mrb[137].mxu0 }
 0x2de   :  { %4948 = vst [vmem:[#allocation66_spill] sm:$0xff] %v3859_v51  ;;  %v3861_v63 = vpop.f32.mrb[138].mxu0 }
 0x2df   :  { %4949 = vst [vmem:[#allocation2_spill] sm:$0xff] %v3861_v63  ;;  %v3863_v7 = vpop.f32.mrb[139].mxu0  ;;  %v1014_v63 = vadd.f32 %v2633_v8, %v3634_v38  ;;  %v2635_v38 = vld [vmem:[%s4690_s1 + $0x10] sm:$0xff] }
 0x2e0   :  { %4950 = vst [vmem:[#allocation3_spill] sm:$0xff] %v3863_v7 }
 0x2e4   :  { %v3865_v47 = vpop.f32.mrb[140].mxu0 }
 0x2e5   :  { %4951 = vst [vmem:[#allocation4_spill] sm:$0xff] %v3865_v47  ;;  %v3867_v46 = vpop.f32.mrb[141].mxu0 }
 0x2e6   :  { %4952 = vst [vmem:[#allocation5_spill] sm:$0xff] %v3867_v46  ;;  %v3869_v4 = vpop.f32.mrb[142].mxu0 }
 0x2e7   :  { %4953 = vst [vmem:[#allocation8_spill] sm:$0xff] %v3869_v4  ;;  %v3871_v53 = vpop.f32.mrb[143].mxu0 }
 0x2e8   :  { %4954 = vst [vmem:[#allocation9_spill] sm:$0xff] %v3871_v53 }
 0x2ec   :  { %v3873_v23 = vpop.f32.mrb[144].mxu0 }
 0x2ed   :  { %4955 = vst [vmem:[#allocation12_spill] sm:$0xff] %v3873_v23  ;;  %v3875_v52 = vpop.f32.mrb[145].mxu0  ;;  %v2634_v23 = vld [vmem:[%s4690_s1 + $0x8] sm:$0xff] }
 0x2ee   :  { %4956 = vst [vmem:[#allocation13_spill] sm:$0xff] %v3875_v52  ;;  %v3881_v47 = vpop.f32.mrb[146].mxu0  ;;  %v1015_v4 = vadd.f32 %v2634_v23, %v3641_v49 }
 0x2ef   :  { %v3883_v7 = vpop.f32.mrb[147].mxu0 }
 0x2f0   :  { %v1120_v40 = vpop.f32.mrb[32].mxu1 }
 0x2f1   :  { %v1346_v34 = vadd.f32 %v1345_v2, %v1120_v40  ;;  %v1122_v62 = vpop.f32.mrb[33].mxu1  ;;  %v1016_v2 = vadd.f32 %v2635_v38, %v3631_v30 }
 0x2f2   :  { %v1123_v46 = vpop.f32.mrb[34].mxu1 }
 0x2f3   :  { %v3889_v52 = vadd.f32 %v1346_v34, %v1014_v63  ;;  %v1349_v53 = vadd.f32 %v1348_v48, %v1123_v46  ;;  %v1125_v24 = vpop.f32.mrb[35].mxu1 }
 0x2f4   :  { %v2636_v24 = vld [vmem:[%s4690_s1 + $0x18] sm:$0xff] }
 0x2f5   :  { %v3891_v51 = vadd.f32 %v1349_v53, %v1015_v4  ;;  %v1584_v8 = vpack.c.bf16 %v1349_v53, %v1346_v34  ;;  %v1017_v4 = vadd.f32 %v2636_v24, %v3637_v1  ;;  %v2637_v1 = vld [vmem:[%s4690_s1 + $0x20] sm:$0xff] }
 0x2f7   :  { %1609 = vmatpush1.bf16.msra.mxu1 %v1584_v8  ;;  %v3908_v8 = vpop.f32.mrb[148].mxu0 }
 0x2f8   :  { %v1128_v62 = vpop.f32.mrb[36].mxu1  ;;  %1610 = vmatprep.subr.bf16.mxu1 %v4872_v27 }
 0x2f9   :  { %v1354_v40 = vadd.f32 %v3799_v60, %v1128_v62  ;;  %v1130_v23 = vpop.f32.mrb[37].mxu1  ;;  %v3911_v60 = vpop.f32.mrb[149].mxu0  ;;  %v1018_v62 = vadd.f32 %v2637_v1, %v3653_v0 }
 0x2fa   :  { %v1131_v63 = vpop.f32.mrb[38].mxu1 }
 0x2fb   :  { %v3903_v53 = vadd.f32 %v1354_v40, %v1016_v2  ;;  %v1357_v46 = vadd.f32 %v3803_v54, %v1131_v63  ;;  %v1133_v49 = vpop.f32.mrb[39].mxu1  ;;  %v3918_v2 = vpop.f32.mrb[150].mxu0  ;;  %v2638_v63 = vld [vmem:[%s4690_s1 + $0x28] sm:$0xff] }
 0x2fc   :  { %v3920_v23 = vpop.f32.mrb[151].mxu0  ;;  %v1019_v24 = vadd.f32 %v2638_v63, %v3660_v9 }
 0x2fd   :  { %v3906_v48 = vadd.f32 %v1357_v46, %v1017_v4  ;;  %v1585_v34 = vpack.c.bf16 %v1357_v46, %v1354_v40 }
 0x2ff   :  { %1611 = vmatpush1.bf16.msra.mxu1 %v1585_v34 }
 0x300   :  { %v1136_v30 = vpop.f32.mrb[40].mxu1  ;;  %1612 = vmatprep.subr.bf16.mxu1 %v4872_v27 }
 0x301   :  { %v1362_v54 = vadd.f32 %v3808_v5, %v1136_v30  ;;  %v1138_v38 = vpop.f32.mrb[41].mxu1  ;;  %v2639_v30 = vld [vmem:[%s4690_s1 + $0x30] sm:$0xff] }
 0x302   :  { %v1139_v40 = vpop.f32.mrb[42].mxu1  ;;  %v1020_v1 = vadd.f32 %v2639_v30, %v3649_v55 }
 0x303   :  { %v3926_v4 = vadd.f32 %v1362_v54, %v1018_v62  ;;  %v1365_v46 = vadd.f32 %v3813_v59, %v1139_v40  ;;  %v1141_v49 = vpop.f32.mrb[43].mxu1  ;;  %v2640_v59 = vld [vmem:[%s4690_s1 + $0x38] sm:$0xff] }
 0x305   :  { %v3929_v0 = vadd.f32 %v1365_v46, %v1019_v24  ;;  %v1586_v5 = vpack.c.bf16 %v1365_v46, %v1362_v54  ;;  %v1021_v54 = vadd.f32 %v2640_v59, %v3656_v11  ;;  %v2641_v11 = vld [vmem:[%s4690_s1 + $0x40] sm:$0xff] }
 0x307   :  { %1613 = vmatpush1.bf16.msra.mxu1 %v1586_v5  ;;  %v3946_v5 = vpop.f32.mrb[152].mxu0 }
 0x308   :  { %v1144_v34 = vpop.f32.mrb[44].mxu1  ;;  %1614 = vmatprep.subr.bf16.mxu1 %v4872_v27 }
 0x309   :  { %v1370_v9 = vadd.f32 %v3805_v45, %v1144_v34  ;;  %v1146_v62 = vpop.f32.mrb[45].mxu1  ;;  %v3949_v45 = vpop.f32.mrb[153].mxu0  ;;  %v1022_v34 = vadd.f32 %v2641_v11, %v3673_v14 }
 0x30a   :  { %v1147_v38 = vpop.f32.mrb[46].mxu1 }
 0x30b   :  { %v3941_v40 = vadd.f32 %v1370_v9, %v1020_v1  ;;  %v1373_v63 = vadd.f32 %v3811_v10, %v1147_v38  ;;  %v1149_v24 = vpop.f32.mrb[47].mxu1  ;;  %v3956_v1 = vpop.f32.mrb[154].mxu0  ;;  %v2642_v38 = vld [vmem:[%s4690_s1 + $0x48] sm:$0xff] }
 0x30c   :  { %v3958_v62 = vpop.f32.mrb[155].mxu0  ;;  %v1023_v59 = vadd.f32 %v2642_v38, %v3680_v35 }
 0x30d   :  { %v3944_v46 = vadd.f32 %v1373_v63, %v1021_v54  ;;  %v1587_v49 = vpack.c.bf16 %v1373_v63, %v1370_v9 }
 0x30f   :  { %1615 = vmatpush1.bf16.msra.mxu1 %v1587_v49 }
 0x310   :  { %v1152_v55 = vpop.f32.mrb[48].mxu1  ;;  %1616 = vmatprep.subr.bf16.mxu1 %v4872_v27 }
 0x311   :  { %v1378_v10 = vadd.f32 %v3818_v3, %v1152_v55  ;;  %v1154_v30 = vpop.f32.mrb[49].mxu1  ;;  %v2643_v55 = vld [vmem:[%s4690_s1 + $0x50] sm:$0xff] }
 0x312   :  { %v1155_v9 = vpop.f32.mrb[50].mxu1  ;;  %v1024_v11 = vadd.f32 %v2643_v55, %v3669_v36 }
 0x313   :  { %v3964_v54 = vadd.f32 %v1378_v10, %v1022_v34  ;;  %v1381_v63 = vadd.f32 %v3823_v18, %v1155_v9  ;;  %v1157_v24 = vpop.f32.mrb[51].mxu1  ;;  %v2644_v18 = vld [vmem:[%s4690_s1 + $0x58] sm:$0xff] }
 0x315   :  { %v3967_v14 = vadd.f32 %v1381_v63, %v1023_v59  ;;  %v1588_v3 = vpack.c.bf16 %v1381_v63, %v1378_v10  ;;  %v1025_v10 = vadd.f32 %v2644_v18, %v3676_v25  ;;  %v2645_v25 = vld [vmem:[%s4690_s1 + $0x60] sm:$0xff] }
 0x317   :  { %1617 = vmatpush1.bf16.msra.mxu1 %v1588_v3  ;;  %v3984_v3 = vpop.f32.mrb[156].mxu0 }
 0x318   :  { %v1160_v49 = vpop.f32.mrb[52].mxu1  ;;  %1618 = vmatprep.subr.bf16.mxu1 %v4872_v27 }
 0x319   :  { %v1386_v35 = vadd.f32 %v3815_v33, %v1160_v49  ;;  %v1162_v34 = vpop.f32.mrb[53].mxu1  ;;  %v3987_v33 = vpop.f32.mrb[157].mxu0  ;;  %v1026_v49 = vadd.f32 %v2645_v25, %v3693_v39 }
 0x31a   :  { %v1163_v30 = vpop.f32.mrb[54].mxu1 }
 0x31b   :  { %v3979_v9 = vadd.f32 %v1386_v35, %v1024_v11  ;;  %v1389_v38 = vadd.f32 %v3821_v21, %v1163_v30  ;;  %v1165_v59 = vpop.f32.mrb[55].mxu1  ;;  %v3994_v11 = vpop.f32.mrb[158].mxu0  ;;  %v2646_v30 = vld [vmem:[%s4690_s1 + $0x68] sm:$0xff] }
 0x31c   :  { %v3996_v34 = vpop.f32.mrb[159].mxu0  ;;  %v1027_v18 = vadd.f32 %v2646_v30, %v3700_v31 }
 0x31d   :  { %v3982_v63 = vadd.f32 %v1389_v38, %v1025_v10  ;;  %v1589_v24 = vpack.c.bf16 %v1389_v38, %v1386_v35 }
 0x31f   :  { %1619 = vmatpush1.bf16.msra.mxu1 %v1589_v24 }
 0x320   :  { %v1168_v36 = vpop.f32.mrb[56].mxu1  ;;  %1620 = vmatprep.subr.bf16.mxu1 %v4872_v27 }
 0x321   :  { %v1394_v21 = vadd.f32 %v3828_v13, %v1168_v36  ;;  %v1170_v55 = vpop.f32.mrb[57].mxu1  ;;  %v2647_v36 = vld [vmem:[%s4690_s1 + $0x70] sm:$0xff] }
 0x322   :  { %v1171_v35 = vpop.f32.mrb[58].mxu1  ;;  %v1028_v25 = vadd.f32 %v2647_v36, %v3689_v22 }
 0x323   :  { %v4002_v10 = vadd.f32 %v1394_v21, %v1026_v49  ;;  %v1397_v38 = vadd.f32 %v3833_v37, %v1171_v35  ;;  %v1173_v59 = vpop.f32.mrb[59].mxu1  ;;  %v2648_v37 = vld [vmem:[%s4690_s1 + $0x78] sm:$0xff] }
 0x325   :  { %v4005_v39 = vadd.f32 %v1397_v38, %v1027_v18  ;;  %v1590_v13 = vpack.c.bf16 %v1397_v38, %v1394_v21  ;;  %v1029_v21 = vadd.f32 %v2648_v37, %v3696_v57 }
 0x327   :  { %1621 = vmatpush1.bf16.msra.mxu1 %v1590_v13 }
 0x328   :  { %v1176_v24 = vpop.f32.mrb[60].mxu1  ;;  %1622 = vmatprep.subr.bf16.mxu1 %v4872_v27 }
 0x329   :  { %v1402_v31 = vadd.f32 %v3825_v16, %v1176_v24  ;;  %v1178_v49 = vpop.f32.mrb[61].mxu1  ;;  %v2649_v16 = vld [vmem:[%s4690_s1 + $0x80] sm:$0xff] }
 0x32a   :  { %v1179_v55 = vpop.f32.mrb[62].mxu1  ;;  %v1030_v13 = vadd.f32 %v2649_v16, %v3503_v15 }
 0x32b   :  { %v4017_v35 = vadd.f32 %v1402_v31, %v1028_v25  ;;  %v1405_v30 = vadd.f32 %v3831_v41, %v1179_v55  ;;  %v1181_v18 = vpop.f32.mrb[63].mxu1  ;;  %v2650_v41 = vld [vmem:[%s4690_s1 + $0x88] sm:$0xff] }
 0x32c   :  { %v1031_v25 = vadd.f32 %v2650_v41, %v3506_v17 }
 0x32d   :  { %v4020_v38 = vadd.f32 %v1405_v30, %v1029_v21  ;;  %v1591_v59 = vpack.c.bf16 %v1405_v30, %v1402_v31 }
 0x32f   :  { %1623 = vmatpush1.bf16.msra.mxu1 %v1591_v59 }
 0x330   :  { %v1184_v22 = vpop.f32.mrb[64].mxu1  ;;  %1624 = vmatprep.subr.bf16.mxu1 %v4872_v27 }
 0x331   :  { %v1410_v57 = vadd.f32 %v3838_v50, %v1184_v22  ;;  %v1186_v24 = vpop.f32.mrb[65].mxu1  ;;  %v2651_v50 = vld [vmem:[%s4690_s1 + $0x90] sm:$0xff] }
 0x332   :  { %v1187_v36 = vpop.f32.mrb[66].mxu1  ;;  %v1032_v30 = vadd.f32 %v2651_v50, %v3511_v58 }
 0x333   :  { %v4032_v31 = vadd.f32 %v1410_v57, %v1030_v13  ;;  %v1413_v49 = vadd.f32 %v3843_v44, %v1187_v36  ;;  %v1189_v55 = vpop.f32.mrb[67].mxu1  ;;  %v2652_v44 = vld [vmem:[%s4690_s1 + $0x98] sm:$0xff] }
 0x334   :  { %v1033_v22 = vadd.f32 %v2652_v44, %v3514_v32 }
 0x335   :  { %v4035_v37 = vadd.f32 %v1413_v49, %v1031_v25  ;;  %v1592_v21 = vpack.c.bf16 %v1413_v49, %v1410_v57 }
 0x337   :  { %1625 = vmatpush1.bf16.msra.mxu1 %v1592_v21 }
 0x338   :  { %v1192_v15 = vpop.f32.mrb[68].mxu1  ;;  %1626 = vmatprep.subr.bf16.mxu1 %v4872_v27 }
 0x339   :  { %v1418_v17 = vadd.f32 %v3835_v42, %v1192_v15  ;;  %v1194_v18 = vpop.f32.mrb[69].mxu1  ;;  %v2653_v42 = vld [vmem:[%s4690_s1 + $0xa0] sm:$0xff] }
 0x33a   :  { %v1195_v59 = vpop.f32.mrb[70].mxu1  ;;  %v1034_v41 = vadd.f32 %v2653_v42, %v3519_v6 }
 0x33b   :  { %v4047_v16 = vadd.f32 %v1418_v17, %v1032_v30  ;;  %v1421_v13 = vadd.f32 %v3841_v19, %v1195_v59  ;;  %v1197_v57 = vpop.f32.mrb[71].mxu1  ;;  %v2654_v19 = vld [vmem:[%s4690_s1 + $0xa8] sm:$0xff] }
 0x33c   :  { %v1035_v55 = vadd.f32 %v2654_v19, %v3522_v28  ;;  %v4958_v19 = vld [vmem:[#allocation68_spill] sm:$0xff] }
 0x33d   :  { %v4050_v24 = vadd.f32 %v1421_v13, %v1033_v22  ;;  %v1593_v36 = vpack.c.bf16 %v1421_v13, %v1418_v17 }
 0x33f   :  { %1627 = vmatpush1.bf16.msra.mxu1 %v1593_v36 }
 0x340   :  { %v1200_v58 = vpop.f32.mrb[72].mxu1  ;;  %1628 = vmatprep.subr.bf16.mxu1 %v4872_v27 }
 0x341   :  { %v1426_v32 = vadd.f32 %v3848_v26, %v1200_v58  ;;  %v1202_v25 = vpop.f32.mrb[73].mxu1  ;;  %v2655_v26 = vld [vmem:[%s4690_s1 + $0xb0] sm:$0xff] }
 0x342   :  { %v1203_v49 = vpop.f32.mrb[74].mxu1  ;;  %v1036_v18 = vadd.f32 %v2655_v26, %v3527_v20 }
 0x343   :  { %v4062_v21 = vadd.f32 %v1426_v32, %v1034_v41  ;;  %v1429_v15 = vadd.f32 %v3855_v56, %v1203_v49  ;;  %v1205_v50 = vpop.f32.mrb[75].mxu1  ;;  %v2656_v56 = vld [vmem:[%s4690_s1 + $0xb8] sm:$0xff] }
 0x344   :  { %v1037_v22 = vadd.f32 %v2656_v56, %v3530_v12  ;;  %v4959_v50 = vld [vmem:[#allocation3_spill] sm:$0xff]  ;;  %v4961_v56 = vld [vmem:[#allocation65_spill] sm:$0xff] }
 0x345   :  { %v4065_v30 = vadd.f32 %v1429_v15, %v1035_v55  ;;  %v1594_v17 = vpack.c.bf16 %v1429_v15, %v1426_v32  ;;  %v4957_v32 = vld [vmem:[#allocation66_spill] sm:$0xff] }
 0x347   :  { %1629 = vmatpush1.bf16.msra.mxu1 %v1594_v17 }
 0x348   :  { %v1208_v6 = vpop.f32.mrb[76].mxu1  ;;  %1630 = vmatprep.subr.bf16.mxu1 %v4872_v27 }
 0x349   :  { %v1434_v28 = vadd.f32 %v3845_v29, %v1208_v6  ;;  %v1210_v59 = vpop.f32.mrb[77].mxu1  ;;  %v2657_v29 = vld [vmem:[%s4690_s1 + $0xc0] sm:$0xff] }
 0x34a   :  { %v1211_v44 = vpop.f32.mrb[78].mxu1  ;;  %v1038_v41 = vadd.f32 %v2657_v29, %v3535_v61  ;;  %v4960_v59 = vld [vmem:[#allocation69_spill] sm:$0xff] }
 0x34b   :  { %v4077_v13 = vadd.f32 %v1434_v28, %v1036_v18  ;;  %v1437_v57 = vadd.f32 %v3850_v43, %v1211_v44  ;;  %v1213_v36 = vpop.f32.mrb[79].mxu1  ;;  %v2658_v43 = vld [vmem:[%s4690_s1 + $0xc8] sm:$0xff] }
 0x34c   :  { %v1039_v55 = vadd.f32 %v2658_v43, %v4958_v19 }
 0x34d   :  { %v4080_v58 = vadd.f32 %v1437_v57, %v1037_v22  ;;  %v1595_v42 = vpack.c.bf16 %v1437_v57, %v1434_v28  ;;  %v2659_v28 = vld [vmem:[%s4690_s1 + $0xd0] sm:$0xff] }
 0x34e   :  { %v1040_v44 = vadd.f32 %v2659_v28, %v4960_v59  ;;  %v2662_v59 = vld [vmem:[%s4690_s1 + $0xe8] sm:$0xff] }
 0x34f   :  { %1631 = vmatpush1.bf16.msra.mxu1 %v1595_v42  ;;  %v2660_v42 = vld [vmem:[%s4690_s1 + $0xd8] sm:$0xff] }
 0x350   :  { %v1216_v20 = vpop.f32.mrb[80].mxu1  ;;  %1632 = vmatprep.subr.bf16.mxu1 %v4872_v27 }
 0x351   :  { %v1442_v12 = vadd.f32 %v4957_v32, %v1216_v20  ;;  %v1218_v25 = vpop.f32.mrb[81].mxu1  ;;  %v4962_v20 = vld [vmem:[#allocation70_spill] sm:$0xff] }
 0x352   :  { %v1219_v49 = vpop.f32.mrb[82].mxu1  ;;  %v1041_v29 = vadd.f32 %v2660_v42, %v4962_v20  ;;  %v4963_v32 = vld [vmem:[#allocation2_spill] sm:$0xff] }
 0x353   :  { %v4092_v15 = vadd.f32 %v1442_v12, %v1038_v41  ;;  %v1445_v17 = vadd.f32 %v4959_v50, %v1219_v49  ;;  %v1221_v6 = vpop.f32.mrb[83].mxu1  ;;  %v4964_v50 = vld [vmem:[#allocation71_spill] sm:$0xff] }
 0x354   :  { %v4965_v6 = vld [vmem:[#allocation5_spill] sm:$0xff] }
 0x355   :  { %v4095_v26 = vadd.f32 %v1445_v17, %v1039_v55  ;;  %v1596_v18 = vpack.c.bf16 %v1445_v17, %v1442_v12  ;;  %v2661_v55 = vld [vmem:[%s4690_s1 + $0xe0] sm:$0xff] }
 0x356   :  { %v1042_v17 = vadd.f32 %v2661_v55, %v4964_v50 }
 0x357   :  { %1633 = vmatpush1.bf16.msra.mxu1 %v1596_v18 }
 0x358   :  { %v1224_v61 = vpop.f32.mrb[84].mxu1  ;;  %1634 = vmatprep.subr.bf16.mxu1 %v4872_v27 }
 0x359   :  { %v1450_v22 = vadd.f32 %v4961_v56, %v1224_v61  ;;  %v1226_v57 = vpop.f32.mrb[85].mxu1 }
 0x35a   :  { %v1227_v36 = vpop.f32.mrb[86].mxu1  ;;  %v4967_v57 = vld [vmem:[#allocation9_spill] sm:$0xff] }
 0x35b   :  { %v4107_v41 = vadd.f32 %v1450_v22, %v1040_v44  ;;  %v1453_v12 = vadd.f32 %v4963_v32, %v1227_v36  ;;  %v1229_v25 = vpop.f32.mrb[87].mxu1  ;;  %v4966_v44 = vld [vmem:[#allocation72_spill] sm:$0xff] }
 0x35c   :  { %v1043_v56 = vadd.f32 %v2662_v59, %v4966_v44  ;;  %v4968_v25 = vld [vmem:[#allocation73_spill] sm:$0xff]  ;;  %v4971_v59 = vld [vmem:[#allocation8_spill] sm:$0xff] }
 0x35d   :  { %v4110_v49 = vadd.f32 %v1453_v12, %v1041_v29  ;;  %v1597_v43 = vpack.c.bf16 %v1453_v12, %v1450_v22  ;;  %v2663_v12 = vld [vmem:[%s4690_s1 + $0xf0] sm:$0xff] }
 0x35f   :  { %1635 = vmatpush1.bf16.msra.mxu1 %v1597_v43  ;;  %v1044_v43 = vadd.f32 %v2663_v12, %v4968_v25  ;;  %v4973_v12 = vld [vmem:[#allocation13_spill] sm:$0xff] }
 0x360   :  { %v1232_v19 = vpop.f32.mrb[88].mxu1  ;;  %1636 = vmatprep.subr.bf16.mxu1 %v4872_v27 }
 0x361   :  { %v1458_v18 = vadd.f32 %v4965_v6, %v1232_v19  ;;  %v1234_v61 = vpop.f32.mrb[89].mxu1  ;;  %v4969_v19 = vld [vmem:[#allocation4_spill] sm:$0xff]  ;;  %v2664_v6 = vld [vmem:[%s4690_s1 + $0xf8] sm:$0xff] }
 0x362   :  { %v1235_v28 = vpop.f32.mrb[90].mxu1  ;;  %v4970_v61 = vld [vmem:[#allocation74_spill] sm:$0xff] }
 0x363   :  { %v4122_v22 = vadd.f32 %v1458_v18, %v1042_v17  ;;  %v1461_v36 = vadd.f32 %v4967_v57, %v1235_v28  ;;  %v1237_v42 = vpop.f32.mrb[91].mxu1 }
 0x364   :  { %v2665_v42 = vld [vmem:[%s4690_s1 + $0x100] sm:$0xff] }
 0x365   :  { %v4125_v20 = vadd.f32 %v1461_v36, %v1043_v56  ;;  %v1598_v29 = vpack.c.bf16 %v1461_v36, %v1458_v18  ;;  %v1045_v18 = vadd.f32 %v2664_v6, %v4970_v61 }
 0x367   :  { %1637 = vmatpush1.bf16.msra.mxu1 %v1598_v29  ;;  %v4972_v29 = vld [vmem:[#allocation75_spill] sm:$0xff] }
 0x368   :  { %v1240_v32 = vpop.f32.mrb[92].mxu1  ;;  %1638 = vmatprep.subr.bf16.mxu1 %v4872_v27 }
 0x369   :  { %v1466_v55 = vadd.f32 %v4969_v19, %v1240_v32  ;;  %v1242_v50 = vpop.f32.mrb[93].mxu1  ;;  %v1046_v32 = vadd.f32 %v2665_v42, %v4972_v29  ;;  %v2669_v42 = vld [vmem:[%s4690_s1 + $0x110] sm:$0xff]  ;;  %v4976_v29 = vld [vmem:[#allocation77_spill] sm:$0xff] }
 0x36a   :  { %v1243_v17 = vpop.f32.mrb[94].mxu1 }
 0x36b   :  { %v4137_v28 = vadd.f32 %v1466_v55, %v1044_v43  ;;  %v1469_v27 = vadd.f32 %v4971_v59, %v1243_v17  ;;  %v1245_v44 = vpop.f32.mrb[95].mxu1  ;;  %v2666_v43 = vld [vmem:[%s4691_s0] ss:$12 sps:$4 sm:$0xff]   ;;  %v4974_v17 = vld [vmem:[#allocation76_spill] sm:$0xff] }
 0x36d   :  { %v4140_v56 = vadd.f32 %v1469_v27, %v1045_v18  ;;  %v1599_v57 = vpack.c.bf16 %v1469_v27, %v1466_v55  ;;  %v2667_v55 = vld [vmem:[%s4690_s1 + $0x108] sm:$0xff] }
 0x36e   :  { %v1047_v6 = vadd.f32 %v2667_v55, %v4974_v17  ;;  %v2668_v27 = vld [vmem:[%s4691_s0 + $0x1c] ss:$12 sps:$4 sm:$0xff]   ;;  %v4978_v55 = vld [vmem:[#allocation78_spill] sm:$0xff] }
 0x36f   :  { %1639 = vmatpush1.bf16.msra.mxu1 %v1599_v57 }
 0x370   :  { %v1248_v36 = vpop.f32.mrb[96].mxu1 }
 0x371   :  { %v1474_v25 = vadd.f32 %v4973_v12, %v1248_v36  ;;  %v1250_v19 = vpop.f32.mrb[97].mxu1  ;;  %v4977_v12 = vld [vmem:[#allocation12_spill] sm:$0xff] }
 0x372   :  { %v1251_v50 = vpop.f32.mrb[98].mxu1  ;;  %1641 = vmatmul.mubr.bf16.vlgmr.msra.gmra.mrb[128].mxu1 %v2666_v43  ;;  %v2670_v43 = vld [vmem:[%s4691_s0 + $0x18] ss:$12 sps:$4 sm:$0xff]  }
 0x373   :  { %v4154_v61 = vadd.f32 %v1474_v25, %v1046_v32  ;;  %v1477_v18 = vadd.f32 %v3883_v7, %v1251_v50  ;;  %v1253_v59 = vpop.f32.mrb[99].mxu1  ;;  %1648 = vmatprep.mubr.bf16.mxu1 %v2668_v27  ;;  %v1048_v32 = vadd.f32 %v2669_v42, %v4976_v29  ;;  %v2672_v27 = vld [vmem:[%s4691_s0 + $0x34] ss:$12 sps:$4 sm:$0xff]  }
 0x374   :  { %v2673_v29 = vld [vmem:[%s4690_s1 + $0x120] sm:$0xff] }
 0x375   :  { %v4160_v44 = vadd.f32 %v1477_v18, %v1047_v6  ;;  %v1600_v57 = vpack.c.bf16 %v1477_v18, %v1474_v25  ;;  %v2671_v25 = vld [vmem:[%s4690_s1 + $0x118] sm:$0xff] }
 0x376   :  { %v1049_v17 = vadd.f32 %v2671_v25, %v4978_v55  ;;  %v4982_v25 = vld [vmem:[#allocation80_spill] sm:$0xff] }
 0x377   :  { %4975 = vst [vmem:[#allocation16_spill] sm:$0xff] %v4160_v44  ;;  %2454 = vmatprep.subr.bf16.mxu0 %v1600_v57 }
 0x378   :  { %v1256_v36 = vpop.f32.mrb[100].mxu1  ;;  %2455 = vmatpush3.bf16.msra.mxu0 %v1600_v57 }
 0x379   :  { %v1482_v7 = vadd.f32 %v4977_v12, %v1256_v36  ;;  %v1258_v19 = vpop.f32.mrb[101].mxu1 }
 0x37a   :  { %v1259_v50 = vpop.f32.mrb[102].mxu1  ;;  %1649 = vmatmul.mubr.bf16.gmra.mrb[132].mxu1 %v2670_v43  ;;  %v2674_v43 = vld [vmem:[%s4691_s0 + $0x30] ss:$12 sps:$4 sm:$0xff]  }
 0x37b   :  { %v4174_v6 = vadd.f32 %v1482_v7, %v1048_v32  ;;  %v1485_v18 = vadd.f32 %v3881_v47, %v1259_v50  ;;  %v1261_v59 = vpop.f32.mrb[103].mxu1  ;;  %1656 = vmatprep.mubr.bf16.mxu1 %v2672_v27  ;;  %v4981_v32 = vld [vmem:[#allocation79_spill] sm:$0xff] }
 0x37c   :  { %v1050_v12 = vadd.f32 %v2673_v29, %v4981_v32  ;;  %v2677_v29 = vld [vmem:[%s4690_s1 + $0x130] sm:$0xff]  ;;  %v4985_v32 = vld [vmem:[#allocation81_spill] sm:$0xff] }
 0x37d   :  { %4979 = vst [vmem:[#allocation17_spill] sm:$0xff] %v4174_v6  ;;  %v4180_v57 = vadd.f32 %v1485_v18, %v1049_v17  ;;  %v1601_v36 = vpack.c.bf16 %v1485_v18, %v1482_v7  ;;  %v2675_v7 = vld [vmem:[%s4690_s1 + $0x128] sm:$0xff] }
 0x37e   :  { %v1051_v55 = vadd.f32 %v2675_v7, %v4982_v25  ;;  %v4986_v7 = vld [vmem:[#allocation82_spill] sm:$0xff] }
 0x37f   :  { %4980 = vst [vmem:[#allocation6_spill] sm:$0xff] %v4180_v57  ;;  %2456 = vmatprep.subr.bf16.mxu0 %v1601_v36 }
 0x380   :  { %v1264_v42 = vpop.f32.mrb[104].mxu1  ;;  %2457 = vmatpush3.bf16.msra.mxu0 %v1601_v36 }
 0x381   :  { %v1490_v47 = vadd.f32 %v3911_v60, %v1264_v42  ;;  %v1266_v19 = vpop.f32.mrb[105].mxu1  ;;  %v2676_v60 = vld [vmem:[%s4691_s0 + $0x4c] ss:$12 sps:$4 sm:$0xff]  }
 0x382   :  { %v1267_v50 = vpop.f32.mrb[106].mxu1  ;;  %1657 = vmatmul.mubr.bf16.gmra.mrb[136].mxu1 %v2674_v43  ;;  %v2678_v43 = vld [vmem:[%s4691_s0 + $0x48] ss:$12 sps:$4 sm:$0xff]  }
 0x383   :  { %v4194_v17 = vadd.f32 %v1490_v47, %v1050_v12  ;;  %v1493_v18 = vadd.f32 %v3920_v23, %v1267_v50  ;;  %v1269_v59 = vpop.f32.mrb[107].mxu1  ;;  %1664 = vmatprep.mubr.bf16.mxu1 %v2676_v60  ;;  %v1052_v12 = vadd.f32 %v2677_v29, %v4985_v32  ;;  %v2681_v29 = vld [vmem:[%s4690_s1 + $0x140] sm:$0xff]  ;;  %v4989_v32 = vld [vmem:[#allocation83_spill] sm:$0xff] }
 0x385   :  { %4983 = vst [vmem:[#allocation7_spill] sm:$0xff] %v4194_v17  ;;  %v4200_v27 = vadd.f32 %v1493_v18, %v1051_v55  ;;  %v1602_v36 = vpack.c.bf16 %v1493_v18, %v1490_v47  ;;  %v2679_v47 = vld [vmem:[%s4690_s1 + $0x138] sm:$0xff] }
 0x386   :  { %v1053_v25 = vadd.f32 %v2679_v47, %v4986_v7  ;;  %v4990_v47 = vld [vmem:[#allocation84_spill] sm:$0xff] }
 0x387   :  { %4984 = vst [vmem:[#allocation20_spill] sm:$0xff] %v4200_v27  ;;  %2458 = vmatprep.subr.bf16.mxu0 %v1602_v36 }
 0x388   :  { %v1272_v42 = vpop.f32.mrb[108].mxu1  ;;  %2459 = vmatpush3.bf16.msra.mxu0 %v1602_v36 }
 0x389   :  { %v1498_v23 = vadd.f32 %v3908_v8, %v1272_v42  ;;  %v1274_v19 = vpop.f32.mrb[109].mxu1  ;;  %v2680_v8 = vld [vmem:[%s4691_s0 + $0x64] ss:$12 sps:$4 sm:$0xff]  }
 0x38a   :  { %v1275_v50 = vpop.f32.mrb[110].mxu1  ;;  %1665 = vmatmul.mubr.bf16.gmra.mrb[140].mxu1 %v2678_v43  ;;  %v2682_v43 = vld [vmem:[%s4691_s0 + $0x60] ss:$12 sps:$4 sm:$0xff]  }
 0x38b   :  { %v4214_v55 = vadd.f32 %v1498_v23, %v1052_v12  ;;  %v1501_v18 = vadd.f32 %v3918_v2, %v1275_v50  ;;  %v1277_v59 = vpop.f32.mrb[111].mxu1  ;;  %1672 = vmatprep.mubr.bf16.mxu1 %v2680_v8  ;;  %v1054_v12 = vadd.f32 %v2681_v29, %v4989_v32  ;;  %v2685_v29 = vld [vmem:[%s4690_s1 + $0x150] sm:$0xff]  ;;  %v4993_v32 = vld [vmem:[#allocation85_spill] sm:$0xff] }
 0x38d   :  { %4987 = vst [vmem:[#allocation21_spill] sm:$0xff] %v4214_v55  ;;  %v4220_v60 = vadd.f32 %v1501_v18, %v1053_v25  ;;  %v1603_v36 = vpack.c.bf16 %v1501_v18, %v1498_v23  ;;  %v2683_v23 = vld [vmem:[%s4690_s1 + $0x148] sm:$0xff] }
 0x38e   :  { %v1055_v7 = vadd.f32 %v2683_v23, %v4990_v47  ;;  %v4994_v23 = vld [vmem:[#allocation86_spill] sm:$0xff] }
 0x38f   :  { %4988 = vst [vmem:[#allocation10_spill] sm:$0xff] %v4220_v60  ;;  %2460 = vmatprep.subr.bf16.mxu0 %v1603_v36 }
 0x390   :  { %v1280_v42 = vpop.f32.mrb[112].mxu1  ;;  %2461 = vmatpush3.bf16.msra.mxu0 %v1603_v36 }
 0x391   :  { %v1506_v2 = vadd.f32 %v3949_v45, %v1280_v42  ;;  %v1282_v19 = vpop.f32.mrb[113].mxu1  ;;  %v2684_v45 = vld [vmem:[%s4691_s0 + $0x7c] ss:$12 sps:$4 sm:$0xff]  }
 0x392   :  { %v1283_v50 = vpop.f32.mrb[114].mxu1  ;;  %1673 = vmatmul.mubr.bf16.gmra.mrb[144].mxu1 %v2682_v43  ;;  %v2686_v43 = vld [vmem:[%s4691_s0 + $0x78] ss:$12 sps:$4 sm:$0xff]  }
 0x393   :  { %v4234_v25 = vadd.f32 %v1506_v2, %v1054_v12  ;;  %v1509_v18 = vadd.f32 %v3958_v62, %v1283_v50  ;;  %v1285_v59 = vpop.f32.mrb[115].mxu1  ;;  %1680 = vmatprep.mubr.bf16.mxu1 %v2684_v45  ;;  %v1056_v12 = vadd.f32 %v2685_v29, %v4993_v32  ;;  %v2689_v29 = vld [vmem:[%s4690_s1 + $0x160] sm:$0xff]  ;;  %v4997_v32 = vld [vmem:[#allocation87_spill] sm:$0xff] }
 0x395   :  { %4991 = vst [vmem:[#allocation11_spill] sm:$0xff] %v4234_v25  ;;  %v4240_v8 = vadd.f32 %v1509_v18, %v1055_v7  ;;  %v1604_v36 = vpack.c.bf16 %v1509_v18, %v1506_v2  ;;  %v2687_v2 = vld [vmem:[%s4690_s1 + $0x158] sm:$0xff] }
 0x396   :  { %v1057_v47 = vadd.f32 %v2687_v2, %v4994_v23  ;;  %v4998_v2 = vld [vmem:[#allocation88_spill] sm:$0xff] }
 0x397   :  { %4992 = vst [vmem:[#allocation24_spill] sm:$0xff] %v4240_v8  ;;  %2462 = vmatprep.subr.bf16.mxu0 %v1604_v36 }
 0x398   :  { %v1288_v42 = vpop.f32.mrb[116].mxu1  ;;  %2463 = vmatpush3.bf16.msra.mxu0 %v1604_v36 }
 0x399   :  { %v1514_v62 = vadd.f32 %v3946_v5, %v1288_v42  ;;  %v1290_v19 = vpop.f32.mrb[117].mxu1  ;;  %v2688_v5 = vld [vmem:[%s4691_s0 + $0x94] ss:$12 sps:$4 sm:$0xff]  }
 0x39a   :  { %v1291_v50 = vpop.f32.mrb[118].mxu1  ;;  %1681 = vmatmul.mubr.bf16.gmra.mrb[148].mxu1 %v2686_v43  ;;  %v2690_v43 = vld [vmem:[%s4691_s0 + $0x90] ss:$12 sps:$4 sm:$0xff]  }
 0x39b   :  { %v4254_v7 = vadd.f32 %v1514_v62, %v1056_v12  ;;  %v1517_v18 = vadd.f32 %v3956_v1, %v1291_v50  ;;  %v1293_v59 = vpop.f32.mrb[119].mxu1  ;;  %1688 = vmatprep.mubr.bf16.mxu1 %v2688_v5  ;;  %v1058_v12 = vadd.f32 %v2689_v29, %v4997_v32  ;;  %v2693_v29 = vld [vmem:[%s4690_s1 + $0x170] sm:$0xff]  ;;  %v5001_v32 = vld [vmem:[#allocation89_spill] sm:$0xff] }
 0x39d   :  { %4995 = vst [vmem:[#allocation27_spill] sm:$0xff] %v4254_v7  ;;  %v4260_v45 = vadd.f32 %v1517_v18, %v1057_v47  ;;  %v1605_v36 = vpack.c.bf16 %v1517_v18, %v1514_v62  ;;  %v2691_v62 = vld [vmem:[%s4690_s1 + $0x168] sm:$0xff] }
 0x39e   :  { %v1059_v23 = vadd.f32 %v2691_v62, %v4998_v2  ;;  %v5002_v62 = vld [vmem:[#allocation90_spill] sm:$0xff] }
 0x39f   :  { %4996 = vst [vmem:[#allocation14_spill] sm:$0xff] %v4260_v45  ;;  %2464 = vmatprep.subr.bf16.mxu0 %v1605_v36 }
 0x3a0   :  { %v1296_v42 = vpop.f32.mrb[120].mxu1  ;;  %2465 = vmatpush3.bf16.msra.mxu0 %v1605_v36 }
 0x3a1   :  { %v1522_v1 = vadd.f32 %v3987_v33, %v1296_v42  ;;  %v1298_v19 = vpop.f32.mrb[121].mxu1  ;;  %v2692_v33 = vld [vmem:[%s4691_s0 + $0xac] ss:$12 sps:$4 sm:$0xff]  }
 0x3a2   :  { %v1299_v50 = vpop.f32.mrb[122].mxu1  ;;  %1689 = vmatmul.mubr.bf16.gmra.mrb[152].mxu1 %v2690_v43  ;;  %v2694_v43 = vld [vmem:[%s4691_s0 + $0xa8] ss:$12 sps:$4 sm:$0xff]  }
 0x3a3   :  { %v4274_v47 = vadd.f32 %v1522_v1, %v1058_v12  ;;  %v1525_v18 = vadd.f32 %v3996_v34, %v1299_v50  ;;  %v1301_v59 = vpop.f32.mrb[123].mxu1  ;;  %1696 = vmatprep.mubr.bf16.mxu1 %v2692_v33  ;;  %v1060_v12 = vadd.f32 %v2693_v29, %v5001_v32  ;;  %v2699_v29 = vld [vmem:[%s4691_s0 + $0xdc] ss:$12 sps:$4 sm:$0xff]   ;;  %v2700_v32 = vld [vmem:[%s4691_s0 + $0x38] ss:$12 sps:$4 sm:$0xff]  }
 0x3a5   :  { %4999 = vst [vmem:[#allocation15_spill] sm:$0xff] %v4274_v47  ;;  %v4280_v5 = vadd.f32 %v1525_v18, %v1059_v23  ;;  %v1606_v36 = vpack.c.bf16 %v1525_v18, %v1522_v1  ;;  %v2695_v1 = vld [vmem:[%s4690_s1 + $0x178] sm:$0xff] }
 0x3a6   :  { %v1061_v2 = vadd.f32 %v2695_v1, %v5002_v62  ;;  %v2706_v1 = vld [vmem:[%s4691_s0 + $0x80] ss:$12 sps:$4 sm:$0xff]  }
 0x3a7   :  { %5000 = vst [vmem:[#allocation28_spill] sm:$0xff] %v4280_v5  ;;  %2466 = vmatprep.subr.bf16.mxu0 %v1606_v36  ;;  %v2707_v62 = vld [vmem:[%s4691_s0 + $0x10c] ss:$12 sps:$4 sm:$0xff]  }
 0x3a8   :  { %v1304_v42 = vpop.f32.mrb[124].mxu1  ;;  %2467 = vmatpush3.bf16.msra.mxu0 %v1606_v36 }
 0x3a9   :  { %v1530_v34 = vadd.f32 %v3984_v3, %v1304_v42  ;;  %v1306_v19 = vpop.f32.mrb[125].mxu1  ;;  %v2696_v3 = vld [vmem:[%s4691_s0 + $0xc4] ss:$12 sps:$4 sm:$0xff]   ;;  %v2697_v42 = vld [vmem:[%s4691_s0 + $0xc0] ss:$12 sps:$4 sm:$0xff]  }
 0x3aa   :  { %v1307_v50 = vpop.f32.mrb[126].mxu1  ;;  %1697 = vmatmul.mubr.bf16.gmra.mrb[156].mxu1 %v2694_v43  ;;  %v2703_v19 = vld [vmem:[%s4691_s0 + $0xf4] ss:$12 sps:$4 sm:$0xff]   ;;  %v2705_v43 = vld [vmem:[%s4691_s0 + $0xf0] ss:$12 sps:$4 sm:$0xff]  }
 0x3ab   :  { %v4294_v23 = vadd.f32 %v1530_v34, %v1060_v12  ;;  %v1533_v18 = vadd.f32 %v3994_v11, %v1307_v50  ;;  %1704 = vmatprep.mubr.bf16.mxu1 %v2696_v3  ;;  %v1309_v59 = vpop.f32.mrb[127].mxu1  ;;  %v2698_v11 = vld [vmem:[%s4691_s0 + $0x20] ss:$12 sps:$4 sm:$0xff]   ;;  %v2701_v12 = vld [vmem:[%s4691_s0 + $0xd8] ss:$12 sps:$4 sm:$0xff]  }
 0x3ac   :  { %v2704_v50 = vld [vmem:[%s4691_s0 + $0x68] ss:$12 sps:$4 sm:$0xff]   ;;  %v2710_v3 = vld [vmem:[%s4691_s0 + $0xb0] ss:$12 sps:$4 sm:$0xff]  }
 0x3ad   :  { %5003 = vst [vmem:[#allocation64_spill] sm:$0xff] %v4294_v23  ;;  %v4300_v33 = vadd.f32 %v1533_v18, %v1061_v2  ;;  %v1607_v36 = vpack.c.bf16 %v1533_v18, %v1530_v34  ;;  %v2702_v34 = vld [vmem:[%s4691_s0 + $0x50] ss:$12 sps:$4 sm:$0xff]   ;;  %v2708_v2 = vld [vmem:[%s4691_s0 + $0x98] ss:$12 sps:$4 sm:$0xff]  }
 0x3ae   :  { %v2709_v18 = vld [vmem:[%s4691_s0 + $0x108] ss:$12 sps:$4 sm:$0xff]   ;;  %v2711_v59 = vld [vmem:[%s4691_s0 + $0x124] ss:$12 sps:$4 sm:$0xff]  }
 0x3af   :  { %5004 = vst [vmem:[#allocation18_spill] sm:$0xff] %v4300_v33  ;;  %2468 = vmatprep.subr.bf16.mxu0 %v1607_v36 }
 0x3b0   :  { %2469 = vmatpush3.bf16.msra.mxu0 %v1607_v36  ;;  %v5005_v36 = vld [vmem:[#allocation67_spill] sm:$0xff] }
 0x3b2   :  { %1705 = vmatmul.mubr.bf16.gmra.mrb[160].mxu1 %v2697_v42  ;;  %v2712_v42 = vld [vmem:[%s4691_s0 + $0x120] ss:$12 sps:$4 sm:$0xff]  }
 0x3b3   :  { %2471 = vmatmul.mubr.bf16.vlgmr.msra.gmra.mrb[160].mxu0 %v2698_v11  ;;  %1712 = vmatprep.mubr.bf16.mxu1 %v2699_v29  ;;  %v2713_v11 = vld [vmem:[%s4691_s0 + $0xe0] ss:$12 sps:$4 sm:$0xff]   ;;  %v2714_v29 = vld [vmem:[%s4691_s0 + $0x13c] ss:$12 sps:$4 sm:$0xff]  }
 0x3b4   :  { %2474 = vmatprep.mubr.bf16.mxu0 %v2700_v32  ;;  %v2715_v32 = vld [vmem:[%s4691_s0 + $0xf8] ss:$12 sps:$4 sm:$0xff]  }
 0x3ba   :  { %1713 = vmatmul.mubr.bf16.gmra.mrb[164].mxu1 %v2701_v12  ;;  %v2716_v12 = vld [vmem:[%s4691_s0 + $0x138] ss:$12 sps:$4 sm:$0xff]  }
 0x3bb   :  { %2475 = vmatmul.mubr.bf16.gmra.mrb[164].mxu0 %v2702_v34  ;;  %1720 = vmatprep.mubr.bf16.mxu1 %v2703_v19  ;;  %v2717_v34 = vld [vmem:[%s4691_s0 + $0x110] ss:$12 sps:$4 sm:$0xff]   ;;  %v2718_v19 = vld [vmem:[%s4691_s0 + $0x154] ss:$12 sps:$4 sm:$0xff]  }
 0x3bc   :  { %2478 = vmatprep.mubr.bf16.mxu0 %v2704_v50  ;;  %v2719_v50 = vld [vmem:[%s4691_s0 + $0x128] ss:$12 sps:$4 sm:$0xff]  }
 0x3c2   :  { %1721 = vmatmul.mubr.bf16.gmra.mrb[168].mxu1 %v2705_v43  ;;  %v2720_v43 = vld [vmem:[%s4691_s0 + $0x150] ss:$12 sps:$4 sm:$0xff]  }
 0x3c3   :  { %2479 = vmatmul.mubr.bf16.gmra.mrb[168].mxu0 %v2706_v1  ;;  %1728 = vmatprep.mubr.bf16.mxu1 %v2707_v62  ;;  %v2721_v1 = vld [vmem:[%s4691_s0 + $0x140] ss:$12 sps:$4 sm:$0xff]  }
 0x3c4   :  { %2482 = vmatprep.mubr.bf16.mxu0 %v2708_v2  ;;  %v2722_v62 = vld [vmem:[%s4691_s0 + $0x16c] ss:$12 sps:$4 sm:$0xff]  }
 0x3c5   :  { %v2723_v2 = vld [vmem:[%s4691_s0 + $0x158] ss:$12 sps:$4 sm:$0xff]  }
 0x3ca   :  { %1729 = vmatmul.mubr.bf16.gmra.mrb[172].mxu1 %v2709_v18  ;;  %v2724_v18 = vld [vmem:[%s4691_s0 + $0x168] ss:$12 sps:$4 sm:$0xff]  }
 0x3cb   :  { %2483 = vmatmul.mubr.bf16.gmra.mrb[172].mxu0 %v2710_v3  ;;  %1736 = vmatprep.mubr.bf16.mxu1 %v2711_v59  ;;  %v2725_v3 = vld [vmem:[%s4691_s0 + $0x170] ss:$12 sps:$4 sm:$0xff]  }
 0x3cc   :  { %2486 = vmatprep.mubr.bf16.mxu0 %v5005_v36  ;;  %v2726_v59 = vld [vmem:[%s4691_s0 + $0x184] ss:$12 sps:$4 sm:$0xff]   ;;  %v2727_v36 = vld [vmem:[%s4691_s0 + $0x188] ss:$12 sps:$4 sm:$0xff]  }
 0x3d2   :  { %1737 = vmatmul.mubr.bf16.gmra.mrb[176].mxu1 %v2712_v42  ;;  %v2728_v42 = vld [vmem:[%s4691_s0 + $0x180] ss:$12 sps:$4 sm:$0xff]  }
 0x3d3   :  { %2487 = vmatmul.mubr.bf16.gmra.mrb[176].mxu0 %v2713_v11  ;;  %1744 = vmatprep.mubr.bf16.mxu1 %v2714_v29  ;;  %v2729_v11 = vld [vmem:[%s4691_s0 + $0x1a0] ss:$12 sps:$4 sm:$0xff]   ;;  %v2730_v29 = vld [vmem:[%s4691_s0 + $0x19c] ss:$12 sps:$4 sm:$0xff]  }
 0x3d4   :  { %2490 = vmatprep.mubr.bf16.mxu0 %v2715_v32  ;;  %v2731_v32 = vld [vmem:[%s4691_s0 + $0x1b8] ss:$12 sps:$4 sm:$0xff]  }
 0x3da   :  { %1745 = vmatmul.mubr.bf16.gmra.mrb[180].mxu1 %v2716_v12  ;;  %v2732_v12 = vld [vmem:[%s4691_s0 + $0x198] ss:$12 sps:$4 sm:$0xff]  }
 0x3db   :  { %2491 = vmatmul.mubr.bf16.gmra.mrb[180].mxu0 %v2717_v34  ;;  %1752 = vmatprep.mubr.bf16.mxu1 %v2718_v19  ;;  %v2733_v34 = vld [vmem:[%s4691_s0 + $0x1b4] ss:$12 sps:$4 sm:$0xff]   ;;  %v2734_v19 = vld [vmem:[%s4691_s0 + $0x1d0] ss:$12 sps:$4 sm:$0xff]  }
 0x3dc   :  { %2494 = vmatprep.mubr.bf16.mxu0 %v2719_v50  ;;  %v2735_v50 = vld [vmem:[%s4691_s0 + $0x1e8] ss:$12 sps:$4 sm:$0xff]  }
 0x3e2   :  { %1753 = vmatmul.mubr.bf16.gmra.mrb[184].mxu1 %v2720_v43  ;;  %v2736_v43 = vld [vmem:[%s4691_s0 + $0x1b0] ss:$12 sps:$4 sm:$0xff]  }
 0x3e3   :  { %2495 = vmatmul.mubr.bf16.gmra.mrb[184].mxu0 %v2721_v1  ;;  %1760 = vmatprep.mubr.bf16.mxu1 %v2722_v62  ;;  %v2737_v1 = vld [vmem:[%s4691_s0 + $0x1cc] ss:$12 sps:$4 sm:$0xff]  }
 0x3e4   :  { %2498 = vmatprep.mubr.bf16.mxu0 %v2723_v2  ;;  %v2738_v62 = vld [vmem:[%s4691_s0 + $0x200] ss:$12 sps:$4 sm:$0xff]   ;;  %v2739_v2 = vld [vmem:[%s4691_s0 + $0x218] ss:$12 sps:$4 sm:$0xff]  }
 0x3ea   :  { %1761 = vmatmul.mubr.bf16.gmra.mrb[188].mxu1 %v2724_v18  ;;  %v2740_v18 = vld [vmem:[%s4691_s0 + $0x1c8] ss:$12 sps:$4 sm:$0xff]  }
 0x3eb   :  { %2499 = vmatmul.mubr.bf16.gmra.mrb[188].mxu0 %v2725_v3  ;;  %1768 = vmatprep.mubr.bf16.mxu1 %v2726_v59  ;;  %v2741_v3 = vld [vmem:[%s4691_s0 + $0x1e4] ss:$12 sps:$4 sm:$0xff]  }
 0x3ec   :  { %2502 = vmatprep.mubr.bf16.mxu0 %v2727_v36  ;;  %v2742_v59 = vld [vmem:[%s4691_s0 + $0x230] ss:$12 sps:$4 sm:$0xff]   ;;  %v2743_v36 = vld [vmem:[%s4691_s0 + $0x1e0] ss:$12 sps:$4 sm:$0xff]  }
 0x3f2   :  { %1769 = vmatmul.mubr.bf16.gmra.mrb[192].mxu1 %v2728_v42  ;;  %v2744_v42 = vld [vmem:[%s4691_s0 + $0x1fc] ss:$12 sps:$4 sm:$0xff]  }
 0x3f3   :  { %2503 = vmatmul.mubr.bf16.gmra.mrb[192].mxu0 %v2729_v11  ;;  %1776 = vmatprep.mubr.bf16.mxu1 %v2730_v29  ;;  %v2745_v11 = vld [vmem:[%s4691_s0 + $0x1f8] ss:$12 sps:$4 sm:$0xff]   ;;  %v2746_v29 = vld [vmem:[%s4691_s0 + $0x214] ss:$12 sps:$4 sm:$0xff]  }
 0x3f4   :  { %2506 = vmatprep.mubr.bf16.mxu0 %v2731_v32  ;;  %v2747_v32 = vld [vmem:[%s4691_s0 + $0x210] ss:$12 sps:$4 sm:$0xff]  }
 0x3fa   :  { %1777 = vmatmul.mubr.bf16.gmra.mrb[196].mxu1 %v2732_v12  ;;  %v2748_v12 = vld [vmem:[%s4691_s0 + $0x22c] ss:$12 sps:$4 sm:$0xff]  }
 0x3fb   :  { %1784 = vmatprep.mubr.bf16.mxu1 %v2733_v34  ;;  %2507 = vmatmul.mubr.bf16.gmra.mrb[196].mxu0 %v2734_v19  ;;  %v2749_v34 = vld [vmem:[%s4691_s0 + $0x228] ss:$12 sps:$4 sm:$0xff]  }
 0x3fc   :  { %2510 = vmatprep.mubr.bf16.mxu0 %v2735_v50 }
 0x402   :  { %1785 = vmatmul.mubr.bf16.gmra.mrb[200].mxu1 %v2736_v43 }
 0x403   :  { %1792 = vmatprep.mubr.bf16.mxu1 %v2737_v1  ;;  %2511 = vmatmul.mubr.bf16.gmra.mrb[200].mxu0 %v2738_v62 }
 0x404   :  { %2514 = vmatprep.mubr.bf16.mxu0 %v2739_v2 }
 0x40a   :  { %1793 = vmatmul.mubr.bf16.gmra.mrb[204].mxu1 %v2740_v18 }
 0x40b   :  { %1800 = vmatprep.mubr.bf16.mxu1 %v2741_v3  ;;  %2515 = vmatmul.mubr.bf16.gmra.mrb[204].mxu0 %v2742_v59 }
 0x412   :  { %1801 = vmatmul.mubr.bf16.gmra.mrb[208].mxu1 %v2743_v36 }
 0x413   :  { %1808 = vmatprep.mubr.bf16.mxu1 %v2744_v42 }
 0x41a   :  { %1809 = vmatmul.mubr.bf16.gmra.mrb[212].mxu1 %v2745_v11 }
 0x41b   :  { %1816 = vmatprep.mubr.bf16.mxu1 %v2746_v29 }
 0x422   :  { %1817 = vmatmul.mubr.bf16.gmra.mrb[216].mxu1 %v2747_v32 }
 0x423   :  { %1824 = vmatprep.mubr.bf16.mxu1 %v2748_v12 }
 0x42a   :  { %1825 = vmatmul.mubr.bf16.gmra.mrb[220].mxu1 %v2749_v34 }
 0x445   :  { %v1642_v19 = vpop.f32.mrb[128].mxu1 }
 0x446   :  { %v1644_v50 = vpop.f32.mrb[129].mxu1 }
 0x447   :  { %v1645_v43 = vpop.f32.mrb[130].mxu1 }
 0x448   :  { %v1647_v1 = vpop.f32.mrb[131].mxu1 }
 0x44d   :  { %v1650_v62 = vpop.f32.mrb[132].mxu1 }
 0x44e   :  { %v1652_v2 = vpop.f32.mrb[133].mxu1 }
 0x44f   :  { %v1653_v18 = vpop.f32.mrb[134].mxu1 }
 0x450   :  { %v1655_v3 = vpop.f32.mrb[135].mxu1 }
 0x455   :  { %v1658_v59 = vpop.f32.mrb[136].mxu1 }
 0x456   :  { %v1660_v36 = vpop.f32.mrb[137].mxu1 }
 0x457   :  { %v1661_v42 = vpop.f32.mrb[138].mxu1 }
 0x458   :  { %v1663_v11 = vpop.f32.mrb[139].mxu1 }
 0x45d   :  { %v1666_v29 = vpop.f32.mrb[140].mxu1 }
 0x45e   :  { %v1668_v32 = vpop.f32.mrb[141].mxu1 }
 0x45f   :  { %v1669_v12 = vpop.f32.mrb[142].mxu1 }
 0x460   :  { %v1671_v33 = vpop.f32.mrb[143].mxu1 }
 0x465   :  { %v4462_v23 = vpop.f32.mrb[144].mxu1 }
 0x466   :  { %v1676_v5 = vpop.f32.mrb[145].mxu1 }
 0x467   :  { %v4464_v34 = vpop.f32.mrb[146].mxu1 }
 0x468   :  { %v1679_v50 = vpop.f32.mrb[147].mxu1 }
 0x46d   :  { %v1682_v47 = vpop.f32.mrb[148].mxu1 }
 0x46e   :  { %v1684_v1 = vpop.f32.mrb[149].mxu1 }
 0x46f   :  { %v1685_v45 = vpop.f32.mrb[150].mxu1 }
 0x470   :  { %v1687_v2 = vpop.f32.mrb[151].mxu1 }
 0x475   :  { %v4466_v7 = vpop.f32.mrb[152].mxu1 }
 0x476   :  { %v1692_v3 = vpop.f32.mrb[153].mxu1 }
 0x477   :  { %v4468_v36 = vpop.f32.mrb[154].mxu1 }
 0x478   :  { %v1695_v11 = vpop.f32.mrb[155].mxu1 }
 0x47d   :  { %v4470_v8 = vpop.f32.mrb[156].mxu1 }
 0x47e   :  { %v1700_v32 = vpop.f32.mrb[157].mxu1 }
 0x47f   :  { %v4472_v33 = vpop.f32.mrb[158].mxu1 }
 0x480   :  { %v1703_v25 = vpop.f32.mrb[159].mxu1 }
 0x485   :  { %v4474_v5 = vpop.f32.mrb[160].mxu1 }
 0x486   :  { %v2472_v60 = vpop.f32.mrb[160].mxu0  ;;  %v1708_v50 = vpop.f32.mrb[161].mxu1 }
 0x487   :  { %v1876_v55 = vadd.f32 %v2472_v60, %v1650_v62  ;;  %v1867_v1 = vpop.f32.mrb[161].mxu0  ;;  %v4476_v27 = vpop.f32.mrb[162].mxu1 }
 0x488   :  { %v1868_v2 = vadd.f32 %v1867_v1, %v1642_v19  ;;  %v2473_v17 = vpop.f32.mrb[162].mxu0  ;;  %v1711_v3 = vpop.f32.mrb[163].mxu1 }
 0x489   :  { %v2060_v57 = vadd.f32 %v1876_v55, %v3903_v53  ;;  %v1879_v11 = vadd.f32 %v2473_v17, %v1653_v18  ;;  %v1870_v6 = vpop.f32.mrb[163].mxu0 }
 0x48a   :  { %v2058_v32 = vadd.f32 %v1868_v2, %v3889_v52  ;;  %v1871_v44 = vadd.f32 %v1870_v6, %v1645_v43 }
 0x48b   :  { %2108 = vst [vmem:[%s4692_s2 + $0x10] sm:$0xff] %v2060_v57  ;;  %v2061_v25 = vadd.f32 %v1879_v11, %v3906_v48 }
 0x48c   :  { %2106 = vst [vmem:[%s4692_s2] sm:$0xff] %v2058_v32  ;;  %v2059_v60 = vadd.f32 %v1871_v44, %v3891_v51 }
 0x48d   :  { %2109 = vst [vmem:[%s4692_s2 + $0x18] sm:$0xff] %v2061_v25  ;;  %v4491_v53 = vpop.f32.mrb[164].mxu1 }
 0x48e   :  { %2107 = vst [vmem:[%s4692_s2 + $0x8] sm:$0xff] %v2059_v60  ;;  %v2476_v52 = vpop.f32.mrb[164].mxu0  ;;  %v1716_v6 = vpop.f32.mrb[165].mxu1 }
 0x48f   :  { %v1892_v57 = vadd.f32 %v2476_v52, %v1666_v29  ;;  %v1883_v48 = vpop.f32.mrb[165].mxu0  ;;  %v4496_v17 = vpop.f32.mrb[166].mxu1 }
 0x490   :  { %v1884_v55 = vadd.f32 %v1883_v48, %v1658_v59  ;;  %v2477_v19 = vpop.f32.mrb[166].mxu0  ;;  %v1719_v43 = vpop.f32.mrb[167].mxu1 }
 0x491   :  { %v2064_v51 = vadd.f32 %v1892_v57, %v3941_v40  ;;  %v1895_v44 = vadd.f32 %v2477_v19, %v1669_v12  ;;  %v1886_v62 = vpop.f32.mrb[167].mxu0 }
 0x492   :  { %v2062_v18 = vadd.f32 %v1884_v55, %v3926_v4  ;;  %v1887_v50 = vadd.f32 %v1886_v62, %v1661_v42 }
 0x493   :  { %2112 = vst [vmem:[%s4692_s2 + $0x30] sm:$0xff] %v2064_v51  ;;  %v2065_v1 = vadd.f32 %v1895_v44, %v3944_v46 }
 0x494   :  { %2110 = vst [vmem:[%s4692_s2 + $0x20] sm:$0xff] %v2062_v18  ;;  %v2063_v59 = vadd.f32 %v1887_v50, %v3929_v0 }
 0x495   :  { %2113 = vst [vmem:[%s4692_s2 + $0x38] sm:$0xff] %v2065_v1  ;;  %v4511_v40 = vpop.f32.mrb[168].mxu1 }
 0x496   :  { %2111 = vst [vmem:[%s4692_s2 + $0x28] sm:$0xff] %v2063_v59  ;;  %v2480_v4 = vpop.f32.mrb[168].mxu0  ;;  %v1724_v42 = vpop.f32.mrb[169].mxu1 }
 0x497   :  { %v1908_v29 = vadd.f32 %v2480_v4, %v1682_v47  ;;  %v1899_v46 = vpop.f32.mrb[169].mxu0  ;;  %v4516_v12 = vpop.f32.mrb[170].mxu1 }
 0x498   :  { %v1900_v2 = vadd.f32 %v1899_v46, %v4462_v23  ;;  %v2481_v3 = vpop.f32.mrb[170].mxu0  ;;  %v1727_v0 = vpop.f32.mrb[171].mxu1 }
 0x499   :  { %v2068_v11 = vadd.f32 %v1908_v29, %v3979_v9  ;;  %v1911_v32 = vadd.f32 %v2481_v3, %v1685_v45  ;;  %v1902_v25 = vpop.f32.mrb[171].mxu0 }
 0x49a   :  { %v2066_v60 = vadd.f32 %v1900_v2, %v3964_v54  ;;  %v1903_v52 = vadd.f32 %v1902_v25, %v4464_v34 }
 0x49b   :  { %2116 = vst [vmem:[%s4692_s2 + $0x50] sm:$0xff] %v2068_v11  ;;  %v2069_v47 = vadd.f32 %v1911_v32, %v3982_v63 }
 0x49c   :  { %2114 = vst [vmem:[%s4692_s2 + $0x40] sm:$0xff] %v2066_v60  ;;  %v2067_v23 = vadd.f32 %v1903_v52, %v3967_v14 }
 0x49d   :  { %2117 = vst [vmem:[%s4692_s2 + $0x58] sm:$0xff] %v2069_v47  ;;  %v1730_v9 = vpop.f32.mrb[172].mxu1 }
 0x49e   :  { %2115 = vst [vmem:[%s4692_s2 + $0x48] sm:$0xff] %v2067_v23  ;;  %v2484_v54 = vpop.f32.mrb[172].mxu0  ;;  %v1732_v45 = vpop.f32.mrb[173].mxu1 }
 0x49f   :  { %v1924_v34 = vadd.f32 %v2484_v54, %v4470_v8  ;;  %v1915_v63 = vpop.f32.mrb[173].mxu0  ;;  %v1733_v6 = vpop.f32.mrb[174].mxu1 }
 0x4a0   :  { %v1916_v57 = vadd.f32 %v1915_v63, %v4466_v7  ;;  %v2485_v48 = vpop.f32.mrb[174].mxu0  ;;  %v1735_v55 = vpop.f32.mrb[175].mxu1 }
 0x4a1   :  { %v2072_v14 = vadd.f32 %v1924_v34, %v4017_v35  ;;  %v1927_v19 = vadd.f32 %v2485_v48, %v4472_v33  ;;  %v1918_v43 = vpop.f32.mrb[175].mxu0 }
 0x4a2   :  { %v2070_v51 = vadd.f32 %v1916_v57, %v4002_v10  ;;  %v1919_v44 = vadd.f32 %v1918_v43, %v4468_v36 }
 0x4a3   :  { %2120 = vst [vmem:[%s4692_s2 + $0x70] sm:$0xff] %v2072_v14  ;;  %v2073_v8 = vadd.f32 %v1927_v19, %v4020_v38 }
 0x4a4   :  { %2118 = vst [vmem:[%s4692_s2 + $0x60] sm:$0xff] %v2070_v51  ;;  %v2071_v7 = vadd.f32 %v1919_v44, %v4005_v39 }
 0x4a5   :  { %2121 = vst [vmem:[%s4692_s2 + $0x78] sm:$0xff] %v2073_v8  ;;  %v1738_v35 = vpop.f32.mrb[176].mxu1 }
 0x4a6   :  { %2119 = vst [vmem:[%s4692_s2 + $0x68] sm:$0xff] %v2071_v7  ;;  %v2488_v10 = vpop.f32.mrb[176].mxu0  ;;  %v1740_v36 = vpop.f32.mrb[177].mxu1 }
 0x4a7   :  { %v1940_v33 = vadd.f32 %v2488_v10, %v4491_v53  ;;  %v1931_v38 = vpop.f32.mrb[177].mxu0  ;;  %v1741_v62 = vpop.f32.mrb[178].mxu1 }
 0x4a8   :  { %v1932_v18 = vadd.f32 %v1931_v38, %v4474_v5  ;;  %v2489_v50 = vpop.f32.mrb[178].mxu0  ;;  %v1743_v1 = vpop.f32.mrb[179].mxu1 }
 0x4a9   :  { %v2076_v39 = vadd.f32 %v1940_v33, %v4047_v16  ;;  %v1943_v59 = vadd.f32 %v2489_v50, %v4496_v17  ;;  %v1934_v4 = vpop.f32.mrb[179].mxu0 }
 0x4aa   :  { %v2074_v42 = vadd.f32 %v1932_v18, %v4032_v31  ;;  %v1935_v29 = vadd.f32 %v1934_v4, %v4476_v27 }
 0x4ab   :  { %2124 = vst [vmem:[%s4692_s2 + $0x90] sm:$0xff] %v2076_v39  ;;  %v2077_v53 = vadd.f32 %v1943_v59, %v4050_v24 }
 0x4ac   :  { %2122 = vst [vmem:[%s4692_s2 + $0x80] sm:$0xff] %v2074_v42  ;;  %v2075_v5 = vadd.f32 %v1935_v29, %v4035_v37  ;;  %v5006_v42 = vld [vmem:[#allocation16_spill] sm:$0xff] }
 0x4ad   :  { %2125 = vst [vmem:[%s4692_s2 + $0x98] sm:$0xff] %v2077_v53  ;;  %v1746_v16 = vpop.f32.mrb[180].mxu1 }
 0x4ae   :  { %2123 = vst [vmem:[%s4692_s2 + $0x88] sm:$0xff] %v2075_v5  ;;  %v2492_v31 = vpop.f32.mrb[180].mxu0  ;;  %v1748_v27 = vpop.f32.mrb[181].mxu1 }
 0x4af   :  { %v1956_v17 = vadd.f32 %v2492_v31, %v1730_v9  ;;  %v1947_v46 = vpop.f32.mrb[181].mxu0  ;;  %v1749_v24 = vpop.f32.mrb[182].mxu1 }
 0x4b0   :  { %v1948_v2 = vadd.f32 %v1947_v46, %v4511_v40  ;;  %v2493_v3 = vpop.f32.mrb[182].mxu0  ;;  %v1751_v0 = vpop.f32.mrb[183].mxu1  ;;  %v5007_v46 = vld [vmem:[#allocation17_spill] sm:$0xff] }
 0x4b1   :  { %v2080_v37 = vadd.f32 %v1956_v17, %v4077_v13  ;;  %v1959_v11 = vadd.f32 %v2493_v3, %v1733_v6  ;;  %v1950_v32 = vpop.f32.mrb[183].mxu0 }
 0x4b2   :  { %v2078_v25 = vadd.f32 %v1948_v2, %v4062_v21  ;;  %v1951_v60 = vadd.f32 %v1950_v32, %v4516_v12 }
 0x4b3   :  { %2128 = vst [vmem:[%s4692_s2 + $0xb0] sm:$0xff] %v2080_v37  ;;  %v2081_v52 = vadd.f32 %v1959_v11, %v4080_v58  ;;  %v5008_v37 = vld [vmem:[#allocation6_spill] sm:$0xff] }
 0x4b4   :  { %2126 = vst [vmem:[%s4692_s2 + $0xa0] sm:$0xff] %v2078_v25  ;;  %v2079_v40 = vadd.f32 %v1951_v60, %v4065_v30 }
 0x4b5   :  { %2129 = vst [vmem:[%s4692_s2 + $0xb8] sm:$0xff] %v2081_v52  ;;  %v1754_v13 = vpop.f32.mrb[184].mxu1 }
 0x4b6   :  { %2127 = vst [vmem:[%s4692_s2 + $0xa8] sm:$0xff] %v2079_v40  ;;  %v2496_v21 = vpop.f32.mrb[184].mxu0  ;;  %v1756_v12 = vpop.f32.mrb[185].mxu1 }
 0x4b7   :  { %v1972_v47 = vadd.f32 %v2496_v21, %v1746_v16  ;;  %v1963_v23 = vpop.f32.mrb[185].mxu0  ;;  %v1757_v58 = vpop.f32.mrb[186].mxu1  ;;  %v5009_v21 = vld [vmem:[#allocation7_spill] sm:$0xff] }
 0x4b8   :  { %v1964_v9 = vadd.f32 %v1963_v23, %v1738_v35  ;;  %v2497_v54 = vpop.f32.mrb[186].mxu0  ;;  %v1759_v45 = vpop.f32.mrb[187].mxu1 }
 0x4b9   :  { %v2084_v34 = vadd.f32 %v1972_v47, %v4107_v41  ;;  %v1975_v30 = vadd.f32 %v2497_v54, %v1749_v24  ;;  %v1966_v63 = vpop.f32.mrb[187].mxu0  ;;  %v5010_v54 = vld [vmem:[#allocation20_spill] sm:$0xff] }
 0x4ba   :  { %v2082_v6 = vadd.f32 %v1964_v9, %v4092_v15  ;;  %v1967_v57 = vadd.f32 %v1966_v63, %v1741_v62 }
 0x4bb   :  { %2132 = vst [vmem:[%s4692_s2 + $0xd0] sm:$0xff] %v2084_v34  ;;  %v2085_v48 = vadd.f32 %v1975_v30, %v4110_v49 }
 0x4bc   :  { %2130 = vst [vmem:[%s4692_s2 + $0xc0] sm:$0xff] %v2082_v6  ;;  %v2083_v55 = vadd.f32 %v1967_v57, %v4095_v26 }
 0x4bd   :  { %2133 = vst [vmem:[%s4692_s2 + $0xd8] sm:$0xff] %v2085_v48  ;;  %v1762_v41 = vpop.f32.mrb[188].mxu1 }
 0x4be   :  { %2131 = vst [vmem:[%s4692_s2 + $0xc8] sm:$0xff] %v2083_v55  ;;  %v2500_v15 = vpop.f32.mrb[188].mxu0  ;;  %v1764_v14 = vpop.f32.mrb[189].mxu1  ;;  %v5011_v55 = vld [vmem:[#allocation21_spill] sm:$0xff] }
 0x4bf   :  { %v1988_v19 = vadd.f32 %v2500_v15, %v1762_v41  ;;  %v1979_v43 = vpop.f32.mrb[189].mxu0  ;;  %v1765_v49 = vpop.f32.mrb[190].mxu1 }
 0x4c0   :  { %v1980_v51 = vadd.f32 %v1979_v43, %v1754_v13  ;;  %v2501_v44 = vpop.f32.mrb[190].mxu0  ;;  %v1767_v8 = vpop.f32.mrb[191].mxu1 }
 0x4c1   :  { %v2088_v7 = vadd.f32 %v1988_v19, %v4137_v28  ;;  %v1991_v26 = vadd.f32 %v2501_v44, %v1765_v49  ;;  %v1982_v35 = vpop.f32.mrb[191].mxu0  ;;  %v5012_v49 = vld [vmem:[#allocation10_spill] sm:$0xff] }
 0x4c2   :  { %v2086_v10 = vadd.f32 %v1980_v51, %v4122_v22  ;;  %v1983_v36 = vadd.f32 %v1982_v35, %v1757_v58  ;;  %v5013_v35 = vld [vmem:[#allocation11_spill] sm:$0xff] }
 0x4c3   :  { %2136 = vst [vmem:[%s4692_s2 + $0xf0] sm:$0xff] %v2088_v7  ;;  %v2089_v33 = vadd.f32 %v1991_v26, %v4140_v56 }
 0x4c4   :  { %2134 = vst [vmem:[%s4692_s2 + $0xe0] sm:$0xff] %v2086_v10  ;;  %v2087_v38 = vadd.f32 %v1983_v36, %v4125_v20 }
 0x4c5   :  { %2137 = vst [vmem:[%s4692_s2 + $0xf8] sm:$0xff] %v2089_v33  ;;  %v1770_v28 = vpop.f32.mrb[192].mxu1 }
 0x4c6   :  { %2135 = vst [vmem:[%s4692_s2 + $0xe8] sm:$0xff] %v2087_v38  ;;  %v2504_v22 = vpop.f32.mrb[192].mxu0  ;;  %v1772_v62 = vpop.f32.mrb[193].mxu1  ;;  %v5014_v38 = vld [vmem:[#allocation24_spill] sm:$0xff] }
 0x4c7   :  { %v1995_v18 = vpop.f32.mrb[193].mxu0  ;;  %v1773_v50 = vpop.f32.mrb[194].mxu1 }
 0x4c8   :  { %v1996_v56 = vadd.f32 %v1995_v18, %v1770_v28  ;;  %v2505_v1 = vpop.f32.mrb[194].mxu0  ;;  %v1775_v39 = vpop.f32.mrb[195].mxu1 }
 0x4c9   :  { %v1998_v59 = vpop.f32.mrb[195].mxu0 }
 0x4ca   :  { %v2090_v4 = vadd.f32 %v1996_v56, %v4154_v61  ;;  %v1999_v20 = vadd.f32 %v1998_v59, %v1773_v50  ;;  %v5015_v56 = vld [vmem:[#allocation27_spill] sm:$0xff] }
 0x4cc   :  { %2138 = vst [vmem:[%s4692_s2 + $0x100] sm:$0xff] %v2090_v4  ;;  %v2091_v29 = vadd.f32 %v1999_v20, %v5006_v42  ;;  %v5016_v4 = vld [vmem:[#allocation14_spill] sm:$0xff] }
 0x4cd   :  { %v1778_v53 = vpop.f32.mrb[196].mxu1 }
 0x4ce   :  { %2139 = vst [vmem:[%s4692_s2 + $0x108] sm:$0xff] %v2091_v29  ;;  %v2004_v5 = vadd.f32 %v2504_v22, %v1778_v53  ;;  %v1780_v16 = vpop.f32.mrb[197].mxu1  ;;  %v2508_v31 = vpop.f32.mrb[196].mxu0 }
 0x4cf   :  { %v1781_v27 = vpop.f32.mrb[198].mxu1  ;;  %v2011_v17 = vpop.f32.mrb[197].mxu0  ;;  %v5017_v16 = vld [vmem:[#allocation15_spill] sm:$0xff] }
 0x4d0   :  { %v2092_v24 = vadd.f32 %v2004_v5, %v5007_v46  ;;  %v2007_v61 = vadd.f32 %v2505_v1, %v1781_v27  ;;  %v1783_v2 = vpop.f32.mrb[199].mxu1  ;;  %v2509_v3 = vpop.f32.mrb[198].mxu0  ;;  %v5018_v46 = vld [vmem:[#allocation28_spill] sm:$0xff] }
 0x4d1   :  { %v2014_v0 = vpop.f32.mrb[199].mxu0 }
 0x4d2   :  { %2140 = vst [vmem:[%s4692_s2 + $0x110] sm:$0xff] %v2092_v24  ;;  %v2093_v11 = vadd.f32 %v2007_v61, %v5008_v37  ;;  %v5019_v37 = vld [vmem:[#allocation64_spill] sm:$0xff] }
 0x4d4   :  { %2141 = vst [vmem:[%s4692_s2 + $0x118] sm:$0xff] %v2093_v11 }
 0x4d5   :  { %v1786_v32 = vpop.f32.mrb[200].mxu1 }
 0x4d6   :  { %v2012_v25 = vadd.f32 %v2011_v17, %v1786_v32  ;;  %v1788_v60 = vpop.f32.mrb[201].mxu1  ;;  %v2512_v52 = vpop.f32.mrb[200].mxu0 }
 0x4d7   :  { %v1789_v40 = vpop.f32.mrb[202].mxu1  ;;  %v2027_v13 = vpop.f32.mrb[201].mxu0  ;;  %v5020_v60 = vld [vmem:[#allocation18_spill] sm:$0xff] }
 0x4d8   :  { %v2094_v12 = vadd.f32 %v2012_v25, %v5009_v21  ;;  %v2015_v47 = vadd.f32 %v2014_v0, %v1789_v40  ;;  %v1791_v23 = vpop.f32.mrb[203].mxu1  ;;  %v2513_v58 = vpop.f32.mrb[202].mxu0 }
 0x4d9   :  { %v2030_v9 = vpop.f32.mrb[203].mxu0 }
 0x4da   :  { %2142 = vst [vmem:[%s4692_s2 + $0x120] sm:$0xff] %v2094_v12  ;;  %v2095_v45 = vadd.f32 %v2015_v47, %v5010_v54 }
 0x4dc   :  { %2143 = vst [vmem:[%s4692_s2 + $0x128] sm:$0xff] %v2095_v45 }
 0x4dd   :  { %v1794_v34 = vpop.f32.mrb[204].mxu1 }
 0x4de   :  { %v2020_v30 = vadd.f32 %v2508_v31, %v1794_v34  ;;  %v1796_v63 = vpop.f32.mrb[205].mxu1  ;;  %v2516_v6 = vpop.f32.mrb[204].mxu0 }
 0x4df   :  { %v1797_v57 = vpop.f32.mrb[206].mxu1  ;;  %v2043_v48 = vpop.f32.mrb[205].mxu0 }
 0x4e0   :  { %v2096_v41 = vadd.f32 %v2020_v30, %v5011_v55  ;;  %v2023_v15 = vadd.f32 %v2509_v3, %v1797_v57  ;;  %v1799_v14 = vpop.f32.mrb[207].mxu1  ;;  %v2517_v19 = vpop.f32.mrb[206].mxu0 }
 0x4e1   :  { %v2046_v43 = vpop.f32.mrb[207].mxu0 }
 0x4e2   :  { %2144 = vst [vmem:[%s4692_s2 + $0x130] sm:$0xff] %v2096_v41  ;;  %v2097_v51 = vadd.f32 %v2023_v15, %v5012_v49 }
 0x4e4   :  { %2145 = vst [vmem:[%s4692_s2 + $0x138] sm:$0xff] %v2097_v51 }
 0x4e5   :  { %v1802_v44 = vpop.f32.mrb[208].mxu1 }
 0x4e6   :  { %v2028_v8 = vadd.f32 %v2027_v13, %v1802_v44  ;;  %v1804_v7 = vpop.f32.mrb[209].mxu1 }
 0x4e7   :  { %v1805_v26 = vpop.f32.mrb[210].mxu1 }
 0x4e8   :  { %v2098_v10 = vadd.f32 %v2028_v8, %v5013_v35  ;;  %v2031_v36 = vadd.f32 %v2030_v9, %v1805_v26  ;;  %v1807_v33 = vpop.f32.mrb[211].mxu1 }
 0x4ea   :  { %2146 = vst [vmem:[%s4692_s2 + $0x140] sm:$0xff] %v2098_v10  ;;  %v2099_v28 = vadd.f32 %v2031_v36, %v5014_v38 }
 0x4ec   :  { %2147 = vst [vmem:[%s4692_s2 + $0x148] sm:$0xff] %v2099_v28 }
 0x4ed   :  { %v1810_v22 = vpop.f32.mrb[212].mxu1 }
 0x4ee   :  { %v2036_v62 = vadd.f32 %v2512_v52, %v1810_v22  ;;  %v1812_v18 = vpop.f32.mrb[213].mxu1 }
 0x4ef   :  { %v1813_v50 = vpop.f32.mrb[214].mxu1 }
 0x4f0   :  { %v2100_v1 = vadd.f32 %v2036_v62, %v5015_v56  ;;  %v2039_v39 = vadd.f32 %v2513_v58, %v1813_v50  ;;  %v1815_v59 = vpop.f32.mrb[215].mxu1 }
 0x4f2   :  { %2148 = vst [vmem:[%s4692_s2 + $0x150] sm:$0xff] %v2100_v1  ;;  %v2101_v20 = vadd.f32 %v2039_v39, %v5016_v4 }
 0x4f4   :  { %2149 = vst [vmem:[%s4692_s2 + $0x158] sm:$0xff] %v2101_v20 }
 0x4f5   :  { %v1818_v42 = vpop.f32.mrb[216].mxu1 }
 0x4f6   :  { %v2044_v29 = vadd.f32 %v2043_v48, %v1818_v42  ;;  %v1820_v53 = vpop.f32.mrb[217].mxu1 }
 0x4f7   :  { %v1821_v5 = vpop.f32.mrb[218].mxu1 }
 0x4f8   :  { %v2102_v31 = vadd.f32 %v2044_v29, %v5017_v16  ;;  %v2047_v27 = vadd.f32 %v2046_v43, %v1821_v5  ;;  %v1823_v17 = vpop.f32.mrb[219].mxu1 }
 0x4fa   :  { %2150 = vst [vmem:[%s4692_s2 + $0x160] sm:$0xff] %v2102_v31  ;;  %v2103_v24 = vadd.f32 %v2047_v27, %v5018_v46 }
 0x4fc   :  { %2151 = vst [vmem:[%s4692_s2 + $0x168] sm:$0xff] %v2103_v24 }
 0x4fd   :  { %v1826_v61 = vpop.f32.mrb[220].mxu1 }
 0x4fe   :  { %v2052_v2 = vadd.f32 %v2516_v6, %v1826_v61  ;;  %v1828_v3 = vpop.f32.mrb[221].mxu1 }
 0x4ff   :  { %v1829_v0 = vpop.f32.mrb[222].mxu1 }
 0x500   :  { %v2104_v11 = vadd.f32 %v2052_v2, %v5019_v37  ;;  %v2055_v32 = vadd.f32 %v2517_v19, %v1829_v0  ;;  %v1831_v25 = vpop.f32.mrb[223].mxu1 }
 0x502   :  { %2152 = vst [vmem:[%s4692_s2 + $0x170] sm:$0xff] %v2104_v11  ;;  %v2105_v52 = vadd.f32 %v2055_v32, %v5020_v60 }
 0x504   :  { %2153 = vst [vmem:[%s4692_s2 + $0x178] sm:$0xff] %v2105_v52 }

</bundles_post_ra>
